<compile_context>
chip_gen: v6e
topology: v6e:2x2x1
jax: 0.10.0
libtpu: 0.0.40
codegen_flags: <defaults>
</compile_context>

<pallas_src>
import math

import jax
import jax.numpy as jnp
from jax.experimental import pallas as pl
from jax.experimental.pallas import tpu as pltpu


LN_EPS = 1e-5   # PyTorch TransformerEncoderLayer default layer_norm_eps


# ----------------------------------------------------------------------------
# Fused encoder-stack Pallas kernel.
# ----------------------------------------------------------------------------
def transformer_encoder_stack(x, params, *, d_model, n_head, block_b=None):
    """Run the whole num_layers post-LN encoder stack in a single pallas_call.

    x:      (B, S, Dp) float32, last dim zero-padded from d_model to Dp (128).
    params: per-layer weights stacked along a leading L axis (prepare_stacked_params);
            matmul weights are bf16, biases / LN params are f32.
    """
    B, S, Dp = x.shape
    L = params["wqkv"].shape[0]
    H = n_head
    hdp = Dp // H                                   # padded per-head dim (16)
    scale = 1.0 / math.sqrt(d_model // n_head)      # PyTorch scales by logical head dim
    inv_d = 1.0 / d_model                           # LayerNorm over logical width only
    TB = B if block_b is None else block_b
    assert B % TB == 0
    nb = B // TB
    M = TB * S                                      # flattened token rows per step

    names = ("wqkv", "bqkv", "wo", "bo", "g1", "b1",
             "w1", "c1", "w2", "c2", "g2", "b2")

    def kernel(x_ref, wqkv_ref, bqkv_ref, wo_ref, bo_ref, g1_ref, b1_ref,
               w1_ref, c1_ref, w2_ref, c2_ref, g2_ref, b2_ref, o_ref, x_scr):
        layer = pl.program_id(1)

        # Load activation into the resident VMEM scratch at the first layer only.
        @pl.when(layer == 0)
        def _():
            x_scr[...] = x_ref[...].reshape(M, Dp).astype(jnp.float32)

        x_f = x_scr[...]                            # (M, Dp) f32
        x_bf = x_f.astype(jnp.bfloat16)

        # ---- fused QKV projection: one (M, Dp) @ (Dp, 3*Dp) MXU matmul ----
        qkv = jnp.dot(x_bf, wqkv_ref[0],
                      preferred_element_type=jnp.float32) + bqkv_ref[0]
        q_all = qkv[:, :Dp].reshape(TB, S, Dp)
        k_all = qkv[:, Dp:2 * Dp].reshape(TB, S, Dp)
        v_all = qkv[:, 2 * Dp:].reshape(TB, S, Dp)

        # ---- per-head scaled-dot-product attention, batched over the batch tile ----
        head_outs = []
        for h in range(H):
            sl = slice(h * hdp, (h + 1) * hdp)
            qh = q_all[:, :, sl].astype(jnp.bfloat16)        # (TB, S, hdp)
            kh = k_all[:, :, sl].astype(jnp.bfloat16)
            vh = v_all[:, :, sl].astype(jnp.bfloat16)
            s = jnp.einsum('bqd,bkd->bqk', qh, kh,
                           preferred_element_type=jnp.float32) * scale
            s = s - jnp.max(s, axis=-1, keepdims=True)
            e = jnp.exp(s)
            p = e * pl.reciprocal(jnp.sum(e, axis=-1, keepdims=True), approx=True)
            oh = jnp.einsum('bqk,bkd->bqd', p.astype(jnp.bfloat16), vh,
                            preferred_element_type=jnp.float32)
            head_outs.append(oh.reshape(M, hdp))
        concat = jnp.concatenate(head_outs, axis=-1)         # (M, Dp) f32

        # ---- fused output projection: concat(heads) @ W_o ----
        attn = jnp.dot(concat.astype(jnp.bfloat16), wo_ref[0],
                       preferred_element_type=jnp.float32) + bo_ref[0]

        # LayerNorm over the logical d_model columns.  Padded columns of y are zero
        # and gamma/beta padding is zero, so sums over the padded row with 1/d_model
        # are exact (var = E[y^2] - mu^2).
        def layer_norm(y, g, b):
            mu = jnp.sum(y, axis=-1, keepdims=True) * inv_d
            ey2 = jnp.sum(y * y, axis=-1, keepdims=True) * inv_d
            var = ey2 - mu * mu
            return (y - mu) * jax.lax.rsqrt(var + LN_EPS) * g + b

        y = layer_norm(x_f + attn, g1_ref[0], b1_ref[0])

        # ---- feed-forward: Linear(D->4D) -> ReLU -> Linear(4D->D) ----
        h1 = jnp.dot(y.astype(jnp.bfloat16), w1_ref[0],
                     preferred_element_type=jnp.float32) + c1_ref[0]
        h1 = jnp.maximum(h1, 0.0)
        ff = jnp.dot(h1.astype(jnp.bfloat16), w2_ref[0],
                     preferred_element_type=jnp.float32) + c2_ref[0]

        z = layer_norm(y + ff, g2_ref[0], b2_ref[0])

        # Keep the activation resident in VMEM for the next layer iteration.
        x_scr[...] = z

        @pl.when(layer == pl.num_programs(1) - 1)
        def _():
            o_ref[...] = z.reshape(TB, S, Dp).astype(o_ref.dtype)

    def _layer_spec(arr):
        # One layer's weights per grid step, indexed by the layer axis.
        return pl.BlockSpec((1,) + arr.shape[1:], lambda b, l: (l, 0, 0))

    act_spec = pl.BlockSpec((TB, S, Dp), lambda b, l: (b, 0, 0))
    in_specs = [act_spec] + [_layer_spec(params[n]) for n in names]

    return pl.pallas_call(
        kernel,
        out_shape=jax.ShapeDtypeStruct((B, S, Dp), x.dtype),
        grid_spec=pltpu.PrefetchScalarGridSpec(
            num_scalar_prefetch=0,
            grid=(nb, L),                       # layer axis innermost -> resident act
            in_specs=in_specs,
            out_specs=act_spec,
            scratch_shapes=[pltpu.VMEM((M, Dp), jnp.float32)],
        ),
        compiler_params=pltpu.CompilerParams(
            dimension_semantics=("parallel", "arbitrary")),
    )(x, *[params[n] for n in names])


# ----------------------------------------------------------------------------
# Parameter construction (deterministic, synthetic) and lane-dense packing.
# ----------------------------------------------------------------------------
def init_layer_params(key, d_model, n_head):
    dff = 4 * d_model
    ks = jax.random.split(key, 6)
    std = 0.02
    return {
        "wq": jax.random.normal(ks[0], (d_model, d_model), jnp.float32) * std,
        "wk": jax.random.normal(ks[1], (d_model, d_model), jnp.float32) * std,
        "wv": jax.random.normal(ks[2], (d_model, d_model), jnp.float32) * std,
        "bq": jnp.zeros((d_model,), jnp.float32),
        "bk": jnp.zeros((d_model,), jnp.float32),
        "bv": jnp.zeros((d_model,), jnp.float32),
        "wo": jax.random.normal(ks[3], (d_model, d_model), jnp.float32) * std,
        "bo": jnp.zeros((d_model,), jnp.float32),
        "g1": jnp.ones((d_model,), jnp.float32),
        "b1": jnp.zeros((d_model,), jnp.float32),
        "w1": jax.random.normal(ks[4], (d_model, dff), jnp.float32) * std,
        "c1": jnp.zeros((dff,), jnp.float32),
        "w2": jax.random.normal(ks[5], (dff, d_model), jnp.float32) * std,
        "c2": jnp.zeros((d_model,), jnp.float32),
        "g2": jnp.ones((d_model,), jnp.float32),
        "b2": jnp.zeros((d_model,), jnp.float32),
    }


def _pad_proj_weight(w, n_head, d_pad):
    """(D_in, H*hd) -> (Dp, H*hdp): zero-pad input rows and per-head output columns."""
    d_in, d_out = w.shape
    hd, hdp = d_out // n_head, d_pad // n_head
    w = w.reshape(d_in, n_head, hd)
    w = jnp.pad(w, ((0, d_pad - d_in), (0, 0), (0, hdp - hd)))
    return w.reshape(d_pad, d_pad)


def _pad_head_bias(b, n_head, d_pad):
    hd, hdp = b.shape[0] // n_head, d_pad // n_head
    b = b.reshape(n_head, hd)
    b = jnp.pad(b, ((0, 0), (0, hdp - hd)))
    return b.reshape(1, d_pad)


def _pad_out_weight(w, n_head, d_pad):
    """(H*hd, D_out) -> (H*hdp, Dp): zero-pad per-head input rows and output columns."""
    d_in, d_out = w.shape
    hd, hdp = d_in // n_head, d_pad // n_head
    w = w.reshape(n_head, hd, d_out)
    w = jnp.pad(w, ((0, 0), (0, hdp - hd), (0, d_pad - d_out)))
    return w.reshape(d_pad, d_pad)


def _pad_last(v, d_pad):
    return jnp.pad(v, ((0, d_pad - v.shape[0]),)).reshape(1, d_pad)


def prepare_stacked_params(layer_params, *, d_model, n_head, d_pad):
    """Pad to the lane-dense D=128 layout, fuse Q/K/V, stack layers along axis 0,
    and cast matmul weights to bf16 (f32 accumulation happens in-kernel)."""
    dff = layer_params[0]["w1"].shape[1]
    cols = {k: [] for k in ("wqkv", "bqkv", "wo", "bo", "g1", "b1",
                            "w1", "c1", "w2", "c2", "g2", "b2")}
    for p in layer_params:
        cols["wqkv"].append(jnp.concatenate(
            [_pad_proj_weight(p[n], n_head, d_pad) for n in ("wq", "wk", "wv")], axis=1))
        cols["bqkv"].append(jnp.concatenate(
            [_pad_head_bias(p[n], n_head, d_pad) for n in ("bq", "bk", "bv")], axis=1))
        cols["wo"].append(_pad_out_weight(p["wo"], n_head, d_pad))
        cols["bo"].append(_pad_last(p["bo"], d_pad))
        cols["g1"].append(_pad_last(p["g1"], d_pad))
        cols["b1"].append(_pad_last(p["b1"], d_pad))
        cols["w1"].append(jnp.pad(p["w1"], ((0, d_pad - d_model), (0, 0))))
        cols["c1"].append(p["c1"].reshape(1, dff))
        cols["w2"].append(jnp.pad(p["w2"], ((0, 0), (0, d_pad - d_model))))
        cols["c2"].append(_pad_last(p["c2"], d_pad))
        cols["g2"].append(_pad_last(p["g2"], d_pad))
        cols["b2"].append(_pad_last(p["b2"], d_pad))
    stk = lambda xs: jnp.stack(xs, axis=0)
    bf16 = lambda x: x.astype(jnp.bfloat16)
    return {
        "wqkv": bf16(stk(cols["wqkv"])),   # (L, Dp, 3*Dp)  bf16
        "bqkv": stk(cols["bqkv"]),         # (L, 1, 3*Dp)   f32
        "wo":   bf16(stk(cols["wo"])),     # (L, Dp, Dp)
        "bo":   stk(cols["bo"]),
        "g1":   stk(cols["g1"]), "b1": stk(cols["b1"]),
        "w1":   bf16(stk(cols["w1"])),     # (L, Dp, dff)
        "c1":   stk(cols["c1"]),
        "w2":   bf16(stk(cols["w2"])),     # (L, dff, Dp)
        "c2":   stk(cols["c2"]),
        "g2":   stk(cols["g2"]), "b2": stk(cols["b2"]),
    }


def init_embedding_params(key, opcode_size, operand_size, d_model, max_length, padding_idx):
    k1, k2, k3 = jax.random.split(key, 3)
    std = 0.02
    opcode_emb = jax.random.normal(k1, (opcode_size, d_model), jnp.float32) * std
    operand_emb = jax.random.normal(k2, (operand_size, d_model), jnp.float32) * std
    pos_emb = jax.random.normal(k3, (max_length, d_model), jnp.float32) * std
    opcode_emb = opcode_emb.at[padding_idx].set(0.0)
    operand_emb = operand_emb.at[padding_idx].set(0.0)
    return {"opcode": opcode_emb, "operand": operand_emb, "pos": pos_emb}


# ----------------------------------------------------------------------------
# Full forward (header=False path).
# ----------------------------------------------------------------------------
def bottom_transformer_forward(opcode_ids, operand_ids, emb_params, stacked,
                               *, d_model, n_head, d_pad):
    B, S = opcode_ids.shape
    # Embedding (gather glue in plain JAX).
    x = (emb_params["opcode"][opcode_ids]
         + emb_params["operand"][operand_ids]
         + emb_params["pos"][None, :S, :])                        # (B, S, D)
    x = jnp.pad(x, ((0, 0), (0, 0), (0, d_pad - d_model)))         # lane-dense layout
    # Whole transformer encoder stack in one Pallas kernel.
    x = transformer_encoder_stack(x, stacked, d_model=d_model, n_head=n_head)
    # header=False: first token's representation, un-padded.
    return x[:, 0, :d_model]                                       # (B, D)


if __name__ == "__main__":
    # Small shapes consistent with the module defaults (d_model=96, n_head=8).
    opcode_size, operand_size = 32, 32
    padding_idx = 0
    d_model, n_head = 96, 8
    d_pad = 128            # lane-dense padded model width used inside the kernel
    num_layers = 2         # reduced from the default 6 for a quick smoke test
    max_length = 251
    batch, seq = 2, 8

    key = jax.random.PRNGKey(0)
    k_emb, k_layers, k_op, k_opr = jax.random.split(key, 4)

    emb_params = init_embedding_params(
        k_emb, opcode_size, operand_size, d_model, max_length, padding_idx)
    layer_keys = jax.random.split(k_layers, num_layers)
    layer_params = [init_layer_params(k, d_model, n_head) for k in layer_keys]
    stacked = prepare_stacked_params(
        layer_params, d_model=d_model, n_head=n_head, d_pad=d_pad)

    opcode_ids = jax.random.randint(k_op, (batch, seq), 1, opcode_size, dtype=jnp.int32)
    operand_ids = jax.random.randint(k_opr, (batch, seq), 1, operand_size, dtype=jnp.int32)

    out = bottom_transformer_forward(
        opcode_ids, operand_ids, emb_params, stacked,
        d_model=d_model, n_head=n_head, d_pad=d_pad)
    out = jax.block_until_ready(out)
    assert out.shape == (batch, d_model), out.shape
    assert jnp.all(jnp.isfinite(out))
    print("KERNEL_OK")
</pallas_src>

<mosaic_0001>
module attributes {stable_mosaic.version = 11 : i64} {
  func.func @kernel(%arg0: i32, %arg1: i32, %arg2: memref<2x8x128xf32, #tpu.memory_space<vmem>>, %arg3: memref<1x128x384xbf16, #tpu.memory_space<vmem>>, %arg4: memref<1x1x384xf32, #tpu.memory_space<vmem>>, %arg5: memref<1x128x128xbf16, #tpu.memory_space<vmem>>, %arg6: memref<1x1x128xf32, #tpu.memory_space<vmem>>, %arg7: memref<1x1x128xf32, #tpu.memory_space<vmem>>, %arg8: memref<1x1x128xf32, #tpu.memory_space<vmem>>, %arg9: memref<1x128x384xbf16, #tpu.memory_space<vmem>>, %arg10: memref<1x1x384xf32, #tpu.memory_space<vmem>>, %arg11: memref<1x384x128xbf16, #tpu.memory_space<vmem>>, %arg12: memref<1x1x128xf32, #tpu.memory_space<vmem>>, %arg13: memref<1x1x128xf32, #tpu.memory_space<vmem>>, %arg14: memref<1x1x128xf32, #tpu.memory_space<vmem>>, %arg15: memref<2x8x128xf32, #tpu.memory_space<vmem>>, %arg16: memref<16x128xf32, #tpu.memory_space<vmem>>) attributes {dimension_semantics = [#tpu.dimension_semantics<parallel>, #tpu.dimension_semantics<arbitrary>], iteration_bounds = array<i64: 1, 2>, scalar_prefetch = 0 : i64, scratch_operands = 1 : i64, tpu.core_type = #tpu.core_type<tc>, window_params = [{transform_indices = @transform_0, window_bounds = array<i64: 2, 8, 128>}, {transform_indices = @transform_1, window_bounds = array<i64: 1, 128, 384>}, {transform_indices = @transform_2, window_bounds = array<i64: 1, 1, 384>}, {transform_indices = @transform_3, window_bounds = array<i64: 1, 128, 128>}, {transform_indices = @transform_4, window_bounds = array<i64: 1, 1, 128>}, {transform_indices = @transform_5, window_bounds = array<i64: 1, 1, 128>}, {transform_indices = @transform_6, window_bounds = array<i64: 1, 1, 128>}, {transform_indices = @transform_7, window_bounds = array<i64: 1, 128, 384>}, {transform_indices = @transform_8, window_bounds = array<i64: 1, 1, 384>}, {transform_indices = @transform_9, window_bounds = array<i64: 1, 384, 128>}, {transform_indices = @transform_10, window_bounds = array<i64: 1, 1, 128>}, {transform_indices = @transform_11, window_bounds = array<i64: 1, 1, 128>}, {transform_indices = @transform_12, window_bounds = array<i64: 1, 1, 128>}, {transform_indices = @transform_13, window_bounds = array<i64: 2, 8, 128>}]} {
    %c0_i32 = arith.constant 0 : i32
    %0 = arith.cmpi eq, %arg1, %c0_i32 : i32
    %1 = arith.extui %0 : i1 to i32
    %c0_i32_0 = arith.constant 0 : i32
    %2 = arith.cmpi ne, %1, %c0_i32_0 : i32
    scf.if %2 {
      %c0_95 = arith.constant 0 : index
      %c0_96 = arith.constant 0 : index
      %c0_97 = arith.constant 0 : index
      %279 = vector.load %arg2[%c0_95, %c0_96, %c0_97] : memref<2x8x128xf32, #tpu.memory_space<vmem>>, vector<2x8x128xf32>
      %280 = vector.shape_cast %279 : vector<2x8x128xf32> to vector<16x128xf32>
      %c0_98 = arith.constant 0 : index
      %c0_99 = arith.constant 0 : index
      %281 = vector.load %arg16[%c0_98, %c0_99] : memref<16x128xf32, #tpu.memory_space<vmem>>, vector<16x128xf32>
      tpu.vector_store %arg16[%c0_98, %c0_99], %280 {strides = array<i32>} : memref<16x128xf32, #tpu.memory_space<vmem>>, vector<16x128xf32>,
    } else {
    }
    %c0 = arith.constant 0 : index
    %c0_1 = arith.constant 0 : index
    %3 = vector.load %arg16[%c0, %c0_1] : memref<16x128xf32, #tpu.memory_space<vmem>>, vector<16x128xf32>
    %4 = arith.truncf %3 : vector<16x128xf32> to vector<16x128xbf16>
    %c0_2 = arith.constant 0 : index
    %c0_3 = arith.constant 0 : index
    %c0_4 = arith.constant 0 : index
    %5 = vector.load %arg3[%c0_2, %c0_3, %c0_4] : memref<1x128x384xbf16, #tpu.memory_space<vmem>>, vector<1x128x384xbf16>
    %6 = vector.shape_cast %5 : vector<1x128x384xbf16> to vector<128x384xbf16>
    %cst = arith.constant dense<0.000000e+00> : vector<16x384xf32>
    %7 = tpu.matmul %4, %6, %cst {dimension_numbers = #tpu.dot_dimension_numbers<[1], [0], [0], [1], [0, 0, 1, 1], [], []>} : vector<16x128xbf16>, vector<128x384xbf16>, vector<16x384xf32> -> vector<16x384xf32>
    %c0_5 = arith.constant 0 : index
    %c0_6 = arith.constant 0 : index
    %c0_7 = arith.constant 0 : index
    %8 = vector.load %arg4[%c0_5, %c0_6, %c0_7] : memref<1x1x384xf32, #tpu.memory_space<vmem>>, vector<1x1x384xf32>
    %9 = vector.shape_cast %8 : vector<1x1x384xf32> to vector<1x384xf32>
    %10 = vector.broadcast %9 : vector<1x384xf32> to vector<16x384xf32>
    %11 = arith.addf %7, %10 : vector<16x384xf32>
    %12 = vector.extract_strided_slice %11 {offsets = [0, 0], sizes = [16, 128], strides = [1, 1]} : vector<16x384xf32> to vector<16x128xf32>
    %13 = vector.shape_cast %12 : vector<16x128xf32> to vector<2x8x128xf32>
    %14 = vector.extract_strided_slice %11 {offsets = [0, 128], sizes = [16, 128], strides = [1, 1]} : vector<16x384xf32> to vector<16x128xf32>
    %15 = vector.shape_cast %14 : vector<16x128xf32> to vector<2x8x128xf32>
    %16 = vector.extract_strided_slice %11 {offsets = [0, 256], sizes = [16, 128], strides = [1, 1]} : vector<16x384xf32> to vector<16x128xf32>
    %17 = vector.shape_cast %16 : vector<16x128xf32> to vector<2x8x128xf32>
    %18 = vector.extract_strided_slice %13 {offsets = [0, 0, 0], sizes = [2, 8, 16], strides = [1, 1, 1]} : vector<2x8x128xf32> to vector<2x8x16xf32>
    %19 = arith.truncf %18 : vector<2x8x16xf32> to vector<2x8x16xbf16>
    %20 = vector.extract_strided_slice %15 {offsets = [0, 0, 0], sizes = [2, 8, 16], strides = [1, 1, 1]} : vector<2x8x128xf32> to vector<2x8x16xf32>
    %21 = arith.truncf %20 : vector<2x8x16xf32> to vector<2x8x16xbf16>
    %22 = vector.extract_strided_slice %17 {offsets = [0, 0, 0], sizes = [2, 8, 16], strides = [1, 1, 1]} : vector<2x8x128xf32> to vector<2x8x16xf32>
    %23 = arith.truncf %22 : vector<2x8x16xf32> to vector<2x8x16xbf16>
    "tpu.trace_start"() <{level = 10 : i32, message = "bqd,bkd->bqk"}> : () -> ()
    %cst_8 = arith.constant dense<0.000000e+00> : vector<2x8x8xf32>
    %24 = tpu.matmul %19, %21, %cst_8 {dimension_numbers = #tpu.dot_dimension_numbers<[2], [2], [1], [1], [0, 0, 0, 1, 1, 1], [0], [0]>} : vector<2x8x16xbf16>, vector<2x8x16xbf16>, vector<2x8x8xf32> -> vector<2x8x8xf32>
    "tpu.trace_stop"() : () -> ()
    %cst_9 = arith.constant 0.288675129 : f32
    %25 = vector.broadcast %cst_9 : f32 to vector<2x8x8xf32>
    %26 = arith.mulf %24, %25 : vector<2x8x8xf32>
    %cst_10 = arith.constant dense<0xFF800000> : vector<2x8xf32>
    %27 = vector.multi_reduction <maximumf>, %26, %cst_10 [2] : vector<2x8x8xf32> to vector<2x8xf32>
    %28 = vector.shape_cast %27 : vector<2x8xf32> to vector<2x8x1xf32>
    %29 = vector.broadcast %28 : vector<2x8x1xf32> to vector<2x8x8xf32>
    %30 = arith.subf %26, %29 : vector<2x8x8xf32>
    %31 = math.exp %30 : vector<2x8x8xf32>
    %cst_11 = arith.constant dense<0.000000e+00> : vector<2x8xf32>
    %32 = vector.multi_reduction <add>, %31, %cst_11 [2] : vector<2x8x8xf32> to vector<2x8xf32>
    %33 = vector.shape_cast %32 : vector<2x8xf32> to vector<2x8x1xf32>
    %34 = tpu.reciprocal %33 {approx = true} : vector<2x8x1xf32> -> vector<2x8x1xf32>
    %35 = vector.broadcast %34 : vector<2x8x1xf32> to vector<2x8x8xf32>
    %36 = arith.mulf %31, %35 : vector<2x8x8xf32>
    %37 = arith.truncf %36 : vector<2x8x8xf32> to vector<2x8x8xbf16>
    "tpu.trace_start"() <{level = 10 : i32, message = "bqk,bkd->bqd"}> : () -> ()
    %cst_12 = arith.constant dense<0.000000e+00> : vector<2x8x16xf32>
    %38 = tpu.matmul %37, %23, %cst_12 {dimension_numbers = #tpu.dot_dimension_numbers<[2], [1], [1], [2], [0, 0, 0, 1, 1, 2], [0], [0]>} : vector<2x8x8xbf16>, vector<2x8x16xbf16>, vector<2x8x16xf32> -> vector<2x8x16xf32>
    "tpu.trace_stop"() : () -> ()
    %39 = vector.shape_cast %38 : vector<2x8x16xf32> to vector<16x16xf32>
    %40 = vector.extract_strided_slice %13 {offsets = [0, 0, 16], sizes = [2, 8, 16], strides = [1, 1, 1]} : vector<2x8x128xf32> to vector<2x8x16xf32>
    %41 = arith.truncf %40 : vector<2x8x16xf32> to vector<2x8x16xbf16>
    %42 = vector.extract_strided_slice %15 {offsets = [0, 0, 16], sizes = [2, 8, 16], strides = [1, 1, 1]} : vector<2x8x128xf32> to vector<2x8x16xf32>
    %43 = arith.truncf %42 : vector<2x8x16xf32> to vector<2x8x16xbf16>
    %44 = vector.extract_strided_slice %17 {offsets = [0, 0, 16], sizes = [2, 8, 16], strides = [1, 1, 1]} : vector<2x8x128xf32> to vector<2x8x16xf32>
    %45 = arith.truncf %44 : vector<2x8x16xf32> to vector<2x8x16xbf16>
    "tpu.trace_start"() <{level = 10 : i32, message = "bqd,bkd->bqk"}> : () -> ()
    %cst_13 = arith.constant dense<0.000000e+00> : vector<2x8x8xf32>
    %46 = tpu.matmul %41, %43, %cst_13 {dimension_numbers = #tpu.dot_dimension_numbers<[2], [2], [1], [1], [0, 0, 0, 1, 1, 1], [0], [0]>} : vector<2x8x16xbf16>, vector<2x8x16xbf16>, vector<2x8x8xf32> -> vector<2x8x8xf32>
    "tpu.trace_stop"() : () -> ()
    %cst_14 = arith.constant 0.288675129 : f32
    %47 = vector.broadcast %cst_14 : f32 to vector<2x8x8xf32>
    %48 = arith.mulf %46, %47 : vector<2x8x8xf32>
    %cst_15 = arith.constant dense<0xFF800000> : vector<2x8xf32>
    %49 = vector.multi_reduction <maximumf>, %48, %cst_15 [2] : vector<2x8x8xf32> to vector<2x8xf32>
    %50 = vector.shape_cast %49 : vector<2x8xf32> to vector<2x8x1xf32>
    %51 = vector.broadcast %50 : vector<2x8x1xf32> to vector<2x8x8xf32>
    %52 = arith.subf %48, %51 : vector<2x8x8xf32>
    %53 = math.exp %52 : vector<2x8x8xf32>
    %cst_16 = arith.constant dense<0.000000e+00> : vector<2x8xf32>
    %54 = vector.multi_reduction <add>, %53, %cst_16 [2] : vector<2x8x8xf32> to vector<2x8xf32>
    %55 = vector.shape_cast %54 : vector<2x8xf32> to vector<2x8x1xf32>
    %56 = tpu.reciprocal %55 {approx = true} : vector<2x8x1xf32> -> vector<2x8x1xf32>
    %57 = vector.broadcast %56 : vector<2x8x1xf32> to vector<2x8x8xf32>
    %58 = arith.mulf %53, %57 : vector<2x8x8xf32>
    %59 = arith.truncf %58 : vector<2x8x8xf32> to vector<2x8x8xbf16>
    "tpu.trace_start"() <{level = 10 : i32, message = "bqk,bkd->bqd"}> : () -> ()
    %cst_17 = arith.constant dense<0.000000e+00> : vector<2x8x16xf32>
    %60 = tpu.matmul %59, %45, %cst_17 {dimension_numbers = #tpu.dot_dimension_numbers<[2], [1], [1], [2], [0, 0, 0, 1, 1, 2], [0], [0]>} : vector<2x8x8xbf16>, vector<2x8x16xbf16>, vector<2x8x16xf32> -> vector<2x8x16xf32>
    "tpu.trace_stop"() : () -> ()
    %61 = vector.shape_cast %60 : vector<2x8x16xf32> to vector<16x16xf32>
    %62 = vector.extract_strided_slice %13 {offsets = [0, 0, 32], sizes = [2, 8, 16], strides = [1, 1, 1]} : vector<2x8x128xf32> to vector<2x8x16xf32>
    %63 = arith.truncf %62 : vector<2x8x16xf32> to vector<2x8x16xbf16>
    %64 = vector.extract_strided_slice %15 {offsets = [0, 0, 32], sizes = [2, 8, 16], strides = [1, 1, 1]} : vector<2x8x128xf32> to vector<2x8x16xf32>
    %65 = arith.truncf %64 : vector<2x8x16xf32> to vector<2x8x16xbf16>
    %66 = vector.extract_strided_slice %17 {offsets = [0, 0, 32], sizes = [2, 8, 16], strides = [1, 1, 1]} : vector<2x8x128xf32> to vector<2x8x16xf32>
    %67 = arith.truncf %66 : vector<2x8x16xf32> to vector<2x8x16xbf16>
    "tpu.trace_start"() <{level = 10 : i32, message = "bqd,bkd->bqk"}> : () -> ()
    %cst_18 = arith.constant dense<0.000000e+00> : vector<2x8x8xf32>
    %68 = tpu.matmul %63, %65, %cst_18 {dimension_numbers = #tpu.dot_dimension_numbers<[2], [2], [1], [1], [0, 0, 0, 1, 1, 1], [0], [0]>} : vector<2x8x16xbf16>, vector<2x8x16xbf16>, vector<2x8x8xf32> -> vector<2x8x8xf32>
    "tpu.trace_stop"() : () -> ()
    %cst_19 = arith.constant 0.288675129 : f32
    %69 = vector.broadcast %cst_19 : f32 to vector<2x8x8xf32>
    %70 = arith.mulf %68, %69 : vector<2x8x8xf32>
    %cst_20 = arith.constant dense<0xFF800000> : vector<2x8xf32>
    %71 = vector.multi_reduction <maximumf>, %70, %cst_20 [2] : vector<2x8x8xf32> to vector<2x8xf32>
    %72 = vector.shape_cast %71 : vector<2x8xf32> to vector<2x8x1xf32>
    %73 = vector.broadcast %72 : vector<2x8x1xf32> to vector<2x8x8xf32>
    %74 = arith.subf %70, %73 : vector<2x8x8xf32>
    %75 = math.exp %74 : vector<2x8x8xf32>
    %cst_21 = arith.constant dense<0.000000e+00> : vector<2x8xf32>
    %76 = vector.multi_reduction <add>, %75, %cst_21 [2] : vector<2x8x8xf32> to vector<2x8xf32>
    %77 = vector.shape_cast %76 : vector<2x8xf32> to vector<2x8x1xf32>
    %78 = tpu.reciprocal %77 {approx = true} : vector<2x8x1xf32> -> vector<2x8x1xf32>
    %79 = vector.broadcast %78 : vector<2x8x1xf32> to vector<2x8x8xf32>
    %80 = arith.mulf %75, %79 : vector<2x8x8xf32>
    %81 = arith.truncf %80 : vector<2x8x8xf32> to vector<2x8x8xbf16>
    "tpu.trace_start"() <{level = 10 : i32, message = "bqk,bkd->bqd"}> : () -> ()
    %cst_22 = arith.constant dense<0.000000e+00> : vector<2x8x16xf32>
    %82 = tpu.matmul %81, %67, %cst_22 {dimension_numbers = #tpu.dot_dimension_numbers<[2], [1], [1], [2], [0, 0, 0, 1, 1, 2], [0], [0]>} : vector<2x8x8xbf16>, vector<2x8x16xbf16>, vector<2x8x16xf32> -> vector<2x8x16xf32>
    "tpu.trace_stop"() : () -> ()
    %83 = vector.shape_cast %82 : vector<2x8x16xf32> to vector<16x16xf32>
    %84 = vector.extract_strided_slice %13 {offsets = [0, 0, 48], sizes = [2, 8, 16], strides = [1, 1, 1]} : vector<2x8x128xf32> to vector<2x8x16xf32>
    %85 = arith.truncf %84 : vector<2x8x16xf32> to vector<2x8x16xbf16>
    %86 = vector.extract_strided_slice %15 {offsets = [0, 0, 48], sizes = [2, 8, 16], strides = [1, 1, 1]} : vector<2x8x128xf32> to vector<2x8x16xf32>
    %87 = arith.truncf %86 : vector<2x8x16xf32> to vector<2x8x16xbf16>
    %88 = vector.extract_strided_slice %17 {offsets = [0, 0, 48], sizes = [2, 8, 16], strides = [1, 1, 1]} : vector<2x8x128xf32> to vector<2x8x16xf32>
    %89 = arith.truncf %88 : vector<2x8x16xf32> to vector<2x8x16xbf16>
    "tpu.trace_start"() <{level = 10 : i32, message = "bqd,bkd->bqk"}> : () -> ()
    %cst_23 = arith.constant dense<0.000000e+00> : vector<2x8x8xf32>
    %90 = tpu.matmul %85, %87, %cst_23 {dimension_numbers = #tpu.dot_dimension_numbers<[2], [2], [1], [1], [0, 0, 0, 1, 1, 1], [0], [0]>} : vector<2x8x16xbf16>, vector<2x8x16xbf16>, vector<2x8x8xf32> -> vector<2x8x8xf32>
    "tpu.trace_stop"() : () -> ()
    %cst_24 = arith.constant 0.288675129 : f32
    %91 = vector.broadcast %cst_24 : f32 to vector<2x8x8xf32>
    %92 = arith.mulf %90, %91 : vector<2x8x8xf32>
    %cst_25 = arith.constant dense<0xFF800000> : vector<2x8xf32>
    %93 = vector.multi_reduction <maximumf>, %92, %cst_25 [2] : vector<2x8x8xf32> to vector<2x8xf32>
    %94 = vector.shape_cast %93 : vector<2x8xf32> to vector<2x8x1xf32>
    %95 = vector.broadcast %94 : vector<2x8x1xf32> to vector<2x8x8xf32>
    %96 = arith.subf %92, %95 : vector<2x8x8xf32>
    %97 = math.exp %96 : vector<2x8x8xf32>
    %cst_26 = arith.constant dense<0.000000e+00> : vector<2x8xf32>
    %98 = vector.multi_reduction <add>, %97, %cst_26 [2] : vector<2x8x8xf32> to vector<2x8xf32>
    %99 = vector.shape_cast %98 : vector<2x8xf32> to vector<2x8x1xf32>
    %100 = tpu.reciprocal %99 {approx = true} : vector<2x8x1xf32> -> vector<2x8x1xf32>
    %101 = vector.broadcast %100 : vector<2x8x1xf32> to vector<2x8x8xf32>
    %102 = arith.mulf %97, %101 : vector<2x8x8xf32>
    %103 = arith.truncf %102 : vector<2x8x8xf32> to vector<2x8x8xbf16>
    "tpu.trace_start"() <{level = 10 : i32, message = "bqk,bkd->bqd"}> : () -> ()
    %cst_27 = arith.constant dense<0.000000e+00> : vector<2x8x16xf32>
    %104 = tpu.matmul %103, %89, %cst_27 {dimension_numbers = #tpu.dot_dimension_numbers<[2], [1], [1], [2], [0, 0, 0, 1, 1, 2], [0], [0]>} : vector<2x8x8xbf16>, vector<2x8x16xbf16>, vector<2x8x16xf32> -> vector<2x8x16xf32>
    "tpu.trace_stop"() : () -> ()
    %105 = vector.shape_cast %104 : vector<2x8x16xf32> to vector<16x16xf32>
    %106 = vector.extract_strided_slice %13 {offsets = [0, 0, 64], sizes = [2, 8, 16], strides = [1, 1, 1]} : vector<2x8x128xf32> to vector<2x8x16xf32>
    %107 = arith.truncf %106 : vector<2x8x16xf32> to vector<2x8x16xbf16>
    %108 = vector.extract_strided_slice %15 {offsets = [0, 0, 64], sizes = [2, 8, 16], strides = [1, 1, 1]} : vector<2x8x128xf32> to vector<2x8x16xf32>
    %109 = arith.truncf %108 : vector<2x8x16xf32> to vector<2x8x16xbf16>
    %110 = vector.extract_strided_slice %17 {offsets = [0, 0, 64], sizes = [2, 8, 16], strides = [1, 1, 1]} : vector<2x8x128xf32> to vector<2x8x16xf32>
    %111 = arith.truncf %110 : vector<2x8x16xf32> to vector<2x8x16xbf16>
    "tpu.trace_start"() <{level = 10 : i32, message = "bqd,bkd->bqk"}> : () -> ()
    %cst_28 = arith.constant dense<0.000000e+00> : vector<2x8x8xf32>
    %112 = tpu.matmul %107, %109, %cst_28 {dimension_numbers = #tpu.dot_dimension_numbers<[2], [2], [1], [1], [0, 0, 0, 1, 1, 1], [0], [0]>} : vector<2x8x16xbf16>, vector<2x8x16xbf16>, vector<2x8x8xf32> -> vector<2x8x8xf32>
    "tpu.trace_stop"() : () -> ()
    %cst_29 = arith.constant 0.288675129 : f32
    %113 = vector.broadcast %cst_29 : f32 to vector<2x8x8xf32>
    %114 = arith.mulf %112, %113 : vector<2x8x8xf32>
    %cst_30 = arith.constant dense<0xFF800000> : vector<2x8xf32>
    %115 = vector.multi_reduction <maximumf>, %114, %cst_30 [2] : vector<2x8x8xf32> to vector<2x8xf32>
    %116 = vector.shape_cast %115 : vector<2x8xf32> to vector<2x8x1xf32>
    %117 = vector.broadcast %116 : vector<2x8x1xf32> to vector<2x8x8xf32>
    %118 = arith.subf %114, %117 : vector<2x8x8xf32>
    %119 = math.exp %118 : vector<2x8x8xf32>
    %cst_31 = arith.constant dense<0.000000e+00> : vector<2x8xf32>
    %120 = vector.multi_reduction <add>, %119, %cst_31 [2] : vector<2x8x8xf32> to vector<2x8xf32>
    %121 = vector.shape_cast %120 : vector<2x8xf32> to vector<2x8x1xf32>
    %122 = tpu.reciprocal %121 {approx = true} : vector<2x8x1xf32> -> vector<2x8x1xf32>
    %123 = vector.broadcast %122 : vector<2x8x1xf32> to vector<2x8x8xf32>
    %124 = arith.mulf %119, %123 : vector<2x8x8xf32>
    %125 = arith.truncf %124 : vector<2x8x8xf32> to vector<2x8x8xbf16>
    "tpu.trace_start"() <{level = 10 : i32, message = "bqk,bkd->bqd"}> : () -> ()
    %cst_32 = arith.constant dense<0.000000e+00> : vector<2x8x16xf32>
    %126 = tpu.matmul %125, %111, %cst_32 {dimension_numbers = #tpu.dot_dimension_numbers<[2], [1], [1], [2], [0, 0, 0, 1, 1, 2], [0], [0]>} : vector<2x8x8xbf16>, vector<2x8x16xbf16>, vector<2x8x16xf32> -> vector<2x8x16xf32>
    "tpu.trace_stop"() : () -> ()
    %127 = vector.shape_cast %126 : vector<2x8x16xf32> to vector<16x16xf32>
    %128 = vector.extract_strided_slice %13 {offsets = [0, 0, 80], sizes = [2, 8, 16], strides = [1, 1, 1]} : vector<2x8x128xf32> to vector<2x8x16xf32>
    %129 = arith.truncf %128 : vector<2x8x16xf32> to vector<2x8x16xbf16>
    %130 = vector.extract_strided_slice %15 {offsets = [0, 0, 80], sizes = [2, 8, 16], strides = [1, 1, 1]} : vector<2x8x128xf32> to vector<2x8x16xf32>
    %131 = arith.truncf %130 : vector<2x8x16xf32> to vector<2x8x16xbf16>
    %132 = vector.extract_strided_slice %17 {offsets = [0, 0, 80], sizes = [2, 8, 16], strides = [1, 1, 1]} : vector<2x8x128xf32> to vector<2x8x16xf32>
    %133 = arith.truncf %132 : vector<2x8x16xf32> to vector<2x8x16xbf16>
    "tpu.trace_start"() <{level = 10 : i32, message = "bqd,bkd->bqk"}> : () -> ()
    %cst_33 = arith.constant dense<0.000000e+00> : vector<2x8x8xf32>
    %134 = tpu.matmul %129, %131, %cst_33 {dimension_numbers = #tpu.dot_dimension_numbers<[2], [2], [1], [1], [0, 0, 0, 1, 1, 1], [0], [0]>} : vector<2x8x16xbf16>, vector<2x8x16xbf16>, vector<2x8x8xf32> -> vector<2x8x8xf32>
    "tpu.trace_stop"() : () -> ()
    %cst_34 = arith.constant 0.288675129 : f32
    %135 = vector.broadcast %cst_34 : f32 to vector<2x8x8xf32>
    %136 = arith.mulf %134, %135 : vector<2x8x8xf32>
    %cst_35 = arith.constant dense<0xFF800000> : vector<2x8xf32>
    %137 = vector.multi_reduction <maximumf>, %136, %cst_35 [2] : vector<2x8x8xf32> to vector<2x8xf32>
    %138 = vector.shape_cast %137 : vector<2x8xf32> to vector<2x8x1xf32>
    %139 = vector.broadcast %138 : vector<2x8x1xf32> to vector<2x8x8xf32>
    %140 = arith.subf %136, %139 : vector<2x8x8xf32>
    %141 = math.exp %140 : vector<2x8x8xf32>
    %cst_36 = arith.constant dense<0.000000e+00> : vector<2x8xf32>
    %142 = vector.multi_reduction <add>, %141, %cst_36 [2] : vector<2x8x8xf32> to vector<2x8xf32>
    %143 = vector.shape_cast %142 : vector<2x8xf32> to vector<2x8x1xf32>
    %144 = tpu.reciprocal %143 {approx = true} : vector<2x8x1xf32> -> vector<2x8x1xf32>
    %145 = vector.broadcast %144 : vector<2x8x1xf32> to vector<2x8x8xf32>
    %146 = arith.mulf %141, %145 : vector<2x8x8xf32>
    %147 = arith.truncf %146 : vector<2x8x8xf32> to vector<2x8x8xbf16>
    "tpu.trace_start"() <{level = 10 : i32, message = "bqk,bkd->bqd"}> : () -> ()
    %cst_37 = arith.constant dense<0.000000e+00> : vector<2x8x16xf32>
    %148 = tpu.matmul %147, %133, %cst_37 {dimension_numbers = #tpu.dot_dimension_numbers<[2], [1], [1], [2], [0, 0, 0, 1, 1, 2], [0], [0]>} : vector<2x8x8xbf16>, vector<2x8x16xbf16>, vector<2x8x16xf32> -> vector<2x8x16xf32>
    "tpu.trace_stop"() : () -> ()
    %149 = vector.shape_cast %148 : vector<2x8x16xf32> to vector<16x16xf32>
    %150 = vector.extract_strided_slice %13 {offsets = [0, 0, 96], sizes = [2, 8, 16], strides = [1, 1, 1]} : vector<2x8x128xf32> to vector<2x8x16xf32>
    %151 = arith.truncf %150 : vector<2x8x16xf32> to vector<2x8x16xbf16>
    %152 = vector.extract_strided_slice %15 {offsets = [0, 0, 96], sizes = [2, 8, 16], strides = [1, 1, 1]} : vector<2x8x128xf32> to vector<2x8x16xf32>
    %153 = arith.truncf %152 : vector<2x8x16xf32> to vector<2x8x16xbf16>
    %154 = vector.extract_strided_slice %17 {offsets = [0, 0, 96], sizes = [2, 8, 16], strides = [1, 1, 1]} : vector<2x8x128xf32> to vector<2x8x16xf32>
    %155 = arith.truncf %154 : vector<2x8x16xf32> to vector<2x8x16xbf16>
    "tpu.trace_start"() <{level = 10 : i32, message = "bqd,bkd->bqk"}> : () -> ()
    %cst_38 = arith.constant dense<0.000000e+00> : vector<2x8x8xf32>
    %156 = tpu.matmul %151, %153, %cst_38 {dimension_numbers = #tpu.dot_dimension_numbers<[2], [2], [1], [1], [0, 0, 0, 1, 1, 1], [0], [0]>} : vector<2x8x16xbf16>, vector<2x8x16xbf16>, vector<2x8x8xf32> -> vector<2x8x8xf32>
    "tpu.trace_stop"() : () -> ()
    %cst_39 = arith.constant 0.288675129 : f32
    %157 = vector.broadcast %cst_39 : f32 to vector<2x8x8xf32>
    %158 = arith.mulf %156, %157 : vector<2x8x8xf32>
    %cst_40 = arith.constant dense<0xFF800000> : vector<2x8xf32>
    %159 = vector.multi_reduction <maximumf>, %158, %cst_40 [2] : vector<2x8x8xf32> to vector<2x8xf32>
    %160 = vector.shape_cast %159 : vector<2x8xf32> to vector<2x8x1xf32>
    %161 = vector.broadcast %160 : vector<2x8x1xf32> to vector<2x8x8xf32>
    %162 = arith.subf %158, %161 : vector<2x8x8xf32>
    %163 = math.exp %162 : vector<2x8x8xf32>
    %cst_41 = arith.constant dense<0.000000e+00> : vector<2x8xf32>
    %164 = vector.multi_reduction <add>, %163, %cst_41 [2] : vector<2x8x8xf32> to vector<2x8xf32>
    %165 = vector.shape_cast %164 : vector<2x8xf32> to vector<2x8x1xf32>
    %166 = tpu.reciprocal %165 {approx = true} : vector<2x8x1xf32> -> vector<2x8x1xf32>
    %167 = vector.broadcast %166 : vector<2x8x1xf32> to vector<2x8x8xf32>
    %168 = arith.mulf %163, %167 : vector<2x8x8xf32>
    %169 = arith.truncf %168 : vector<2x8x8xf32> to vector<2x8x8xbf16>
    "tpu.trace_start"() <{level = 10 : i32, message = "bqk,bkd->bqd"}> : () -> ()
    %cst_42 = arith.constant dense<0.000000e+00> : vector<2x8x16xf32>
    %170 = tpu.matmul %169, %155, %cst_42 {dimension_numbers = #tpu.dot_dimension_numbers<[2], [1], [1], [2], [0, 0, 0, 1, 1, 2], [0], [0]>} : vector<2x8x8xbf16>, vector<2x8x16xbf16>, vector<2x8x16xf32> -> vector<2x8x16xf32>
    "tpu.trace_stop"() : () -> ()
    %171 = vector.shape_cast %170 : vector<2x8x16xf32> to vector<16x16xf32>
    %172 = vector.extract_strided_slice %13 {offsets = [0, 0, 112], sizes = [2, 8, 16], strides = [1, 1, 1]} : vector<2x8x128xf32> to vector<2x8x16xf32>
    %173 = arith.truncf %172 : vector<2x8x16xf32> to vector<2x8x16xbf16>
    %174 = vector.extract_strided_slice %15 {offsets = [0, 0, 112], sizes = [2, 8, 16], strides = [1, 1, 1]} : vector<2x8x128xf32> to vector<2x8x16xf32>
    %175 = arith.truncf %174 : vector<2x8x16xf32> to vector<2x8x16xbf16>
    %176 = vector.extract_strided_slice %17 {offsets = [0, 0, 112], sizes = [2, 8, 16], strides = [1, 1, 1]} : vector<2x8x128xf32> to vector<2x8x16xf32>
    %177 = arith.truncf %176 : vector<2x8x16xf32> to vector<2x8x16xbf16>
    "tpu.trace_start"() <{level = 10 : i32, message = "bqd,bkd->bqk"}> : () -> ()
    %cst_43 = arith.constant dense<0.000000e+00> : vector<2x8x8xf32>
    %178 = tpu.matmul %173, %175, %cst_43 {dimension_numbers = #tpu.dot_dimension_numbers<[2], [2], [1], [1], [0, 0, 0, 1, 1, 1], [0], [0]>} : vector<2x8x16xbf16>, vector<2x8x16xbf16>, vector<2x8x8xf32> -> vector<2x8x8xf32>
    "tpu.trace_stop"() : () -> ()
    %cst_44 = arith.constant 0.288675129 : f32
    %179 = vector.broadcast %cst_44 : f32 to vector<2x8x8xf32>
    %180 = arith.mulf %178, %179 : vector<2x8x8xf32>
    %cst_45 = arith.constant dense<0xFF800000> : vector<2x8xf32>
    %181 = vector.multi_reduction <maximumf>, %180, %cst_45 [2] : vector<2x8x8xf32> to vector<2x8xf32>
    %182 = vector.shape_cast %181 : vector<2x8xf32> to vector<2x8x1xf32>
    %183 = vector.broadcast %182 : vector<2x8x1xf32> to vector<2x8x8xf32>
    %184 = arith.subf %180, %183 : vector<2x8x8xf32>
    %185 = math.exp %184 : vector<2x8x8xf32>
    %cst_46 = arith.constant dense<0.000000e+00> : vector<2x8xf32>
    %186 = vector.multi_reduction <add>, %185, %cst_46 [2] : vector<2x8x8xf32> to vector<2x8xf32>
    %187 = vector.shape_cast %186 : vector<2x8xf32> to vector<2x8x1xf32>
    %188 = tpu.reciprocal %187 {approx = true} : vector<2x8x1xf32> -> vector<2x8x1xf32>
    %189 = vector.broadcast %188 : vector<2x8x1xf32> to vector<2x8x8xf32>
    %190 = arith.mulf %185, %189 : vector<2x8x8xf32>
    %191 = arith.truncf %190 : vector<2x8x8xf32> to vector<2x8x8xbf16>
    "tpu.trace_start"() <{level = 10 : i32, message = "bqk,bkd->bqd"}> : () -> ()
    %cst_47 = arith.constant dense<0.000000e+00> : vector<2x8x16xf32>
    %192 = tpu.matmul %191, %177, %cst_47 {dimension_numbers = #tpu.dot_dimension_numbers<[2], [1], [1], [2], [0, 0, 0, 1, 1, 2], [0], [0]>} : vector<2x8x8xbf16>, vector<2x8x16xbf16>, vector<2x8x16xf32> -> vector<2x8x16xf32>
    "tpu.trace_stop"() : () -> ()
    %193 = vector.shape_cast %192 : vector<2x8x16xf32> to vector<16x16xf32>
    %194 = tpu.concatenate %39, %61, %83, %105, %127, %149, %171, %193 in 1 : vector<16x16xf32>, vector<16x16xf32>, vector<16x16xf32>, vector<16x16xf32>, vector<16x16xf32>, vector<16x16xf32>, vector<16x16xf32>, vector<16x16xf32> -> vector<16x128xf32>
    %195 = arith.truncf %194 : vector<16x128xf32> to vector<16x128xbf16>
    %c0_48 = arith.constant 0 : index
    %c0_49 = arith.constant 0 : index
    %c0_50 = arith.constant 0 : index
    %196 = vector.load %arg5[%c0_48, %c0_49, %c0_50] : memref<1x128x128xbf16, #tpu.memory_space<vmem>>, vector<1x128x128xbf16>
    %197 = vector.shape_cast %196 : vector<1x128x128xbf16> to vector<128x128xbf16>
    %cst_51 = arith.constant dense<0.000000e+00> : vector<16x128xf32>
    %198 = tpu.matmul %195, %197, %cst_51 {dimension_numbers = #tpu.dot_dimension_numbers<[1], [0], [0], [1], [0, 0, 1, 1], [], []>} : vector<16x128xbf16>, vector<128x128xbf16>, vector<16x128xf32> -> vector<16x128xf32>
    %c0_52 = arith.constant 0 : index
    %c0_53 = arith.constant 0 : index
    %c0_54 = arith.constant 0 : index
    %199 = vector.load %arg6[%c0_52, %c0_53, %c0_54] : memref<1x1x128xf32, #tpu.memory_space<vmem>>, vector<1x1x128xf32>
    %200 = vector.shape_cast %199 : vector<1x1x128xf32> to vector<1x128xf32>
    %201 = vector.broadcast %200 : vector<1x128xf32> to vector<16x128xf32>
    %202 = arith.addf %198, %201 : vector<16x128xf32>
    %203 = arith.addf %3, %202 : vector<16x128xf32>
    %c0_55 = arith.constant 0 : index
    %c0_56 = arith.constant 0 : index
    %c0_57 = arith.constant 0 : index
    %204 = vector.load %arg7[%c0_55, %c0_56, %c0_57] : memref<1x1x128xf32, #tpu.memory_space<vmem>>, vector<1x1x128xf32>
    %205 = vector.shape_cast %204 : vector<1x1x128xf32> to vector<1x128xf32>
    %c0_58 = arith.constant 0 : index
    %c0_59 = arith.constant 0 : index
    %c0_60 = arith.constant 0 : index
    %206 = vector.load %arg8[%c0_58, %c0_59, %c0_60] : memref<1x1x128xf32, #tpu.memory_space<vmem>>, vector<1x1x128xf32>
    %207 = vector.shape_cast %206 : vector<1x1x128xf32> to vector<1x128xf32>
    %cst_61 = arith.constant dense<0.000000e+00> : vector<16xf32>
    %208 = vector.multi_reduction <add>, %203, %cst_61 [1] : vector<16x128xf32> to vector<16xf32>
    %209 = vector.shape_cast %208 : vector<16xf32> to vector<16x1xf32>
    %cst_62 = arith.constant 0.010416667 : f32
    %210 = vector.broadcast %cst_62 : f32 to vector<16x1xf32>
    %211 = arith.mulf %209, %210 : vector<16x1xf32>
    %212 = arith.mulf %203, %203 : vector<16x128xf32>
    %cst_63 = arith.constant dense<0.000000e+00> : vector<16xf32>
    %213 = vector.multi_reduction <add>, %212, %cst_63 [1] : vector<16x128xf32> to vector<16xf32>
    %214 = vector.shape_cast %213 : vector<16xf32> to vector<16x1xf32>
    %cst_64 = arith.constant 0.010416667 : f32
    %215 = vector.broadcast %cst_64 : f32 to vector<16x1xf32>
    %216 = arith.mulf %214, %215 : vector<16x1xf32>
    %217 = arith.mulf %211, %211 : vector<16x1xf32>
    %218 = arith.subf %216, %217 : vector<16x1xf32>
    %219 = vector.broadcast %211 : vector<16x1xf32> to vector<16x128xf32>
    %220 = arith.subf %203, %219 : vector<16x128xf32>
    %cst_65 = arith.constant 9.99999974E-6 : f32
    %221 = vector.broadcast %cst_65 : f32 to vector<16x1xf32>
    %222 = arith.addf %218, %221 : vector<16x1xf32>
    %223 = math.rsqrt %222 : vector<16x1xf32>
    %224 = vector.broadcast %223 : vector<16x1xf32> to vector<16x128xf32>
    %225 = arith.mulf %220, %224 : vector<16x128xf32>
    %226 = vector.broadcast %205 : vector<1x128xf32> to vector<16x128xf32>
    %227 = arith.mulf %225, %226 : vector<16x128xf32>
    %228 = vector.broadcast %207 : vector<1x128xf32> to vector<16x128xf32>
    %229 = arith.addf %227, %228 : vector<16x128xf32>
    %230 = arith.truncf %229 : vector<16x128xf32> to vector<16x128xbf16>
    %c0_66 = arith.constant 0 : index
    %c0_67 = arith.constant 0 : index
    %c0_68 = arith.constant 0 : index
    %231 = vector.load %arg9[%c0_66, %c0_67, %c0_68] : memref<1x128x384xbf16, #tpu.memory_space<vmem>>, vector<1x128x384xbf16>
    %232 = vector.shape_cast %231 : vector<1x128x384xbf16> to vector<128x384xbf16>
    %cst_69 = arith.constant dense<0.000000e+00> : vector<16x384xf32>
    %233 = tpu.matmul %230, %232, %cst_69 {dimension_numbers = #tpu.dot_dimension_numbers<[1], [0], [0], [1], [0, 0, 1, 1], [], []>} : vector<16x128xbf16>, vector<128x384xbf16>, vector<16x384xf32> -> vector<16x384xf32>
    %c0_70 = arith.constant 0 : index
    %c0_71 = arith.constant 0 : index
    %c0_72 = arith.constant 0 : index
    %234 = vector.load %arg10[%c0_70, %c0_71, %c0_72] : memref<1x1x384xf32, #tpu.memory_space<vmem>>, vector<1x1x384xf32>
    %235 = vector.shape_cast %234 : vector<1x1x384xf32> to vector<1x384xf32>
    %236 = vector.broadcast %235 : vector<1x384xf32> to vector<16x384xf32>
    %237 = arith.addf %233, %236 : vector<16x384xf32>
    %cst_73 = arith.constant 0.000000e+00 : f32
    %238 = vector.broadcast %cst_73 : f32 to vector<16x384xf32>
    %239 = arith.maximumf %237, %238 : vector<16x384xf32>
    %240 = arith.truncf %239 : vector<16x384xf32> to vector<16x384xbf16>
    %c0_74 = arith.constant 0 : index
    %c0_75 = arith.constant 0 : index
    %c0_76 = arith.constant 0 : index
    %241 = vector.load %arg11[%c0_74, %c0_75, %c0_76] : memref<1x384x128xbf16, #tpu.memory_space<vmem>>, vector<1x384x128xbf16>
    %242 = vector.shape_cast %241 : vector<1x384x128xbf16> to vector<384x128xbf16>
    %cst_77 = arith.constant dense<0.000000e+00> : vector<16x128xf32>
    %243 = tpu.matmul %240, %242, %cst_77 {dimension_numbers = #tpu.dot_dimension_numbers<[1], [0], [0], [1], [0, 0, 1, 1], [], []>} : vector<16x384xbf16>, vector<384x128xbf16>, vector<16x128xf32> -> vector<16x128xf32>
    %c0_78 = arith.constant 0 : index
    %c0_79 = arith.constant 0 : index
    %c0_80 = arith.constant 0 : index
    %244 = vector.load %arg12[%c0_78, %c0_79, %c0_80] : memref<1x1x128xf32, #tpu.memory_space<vmem>>, vector<1x1x128xf32>
    %245 = vector.shape_cast %244 : vector<1x1x128xf32> to vector<1x128xf32>
    %246 = vector.broadcast %245 : vector<1x128xf32> to vector<16x128xf32>
    %247 = arith.addf %243, %246 : vector<16x128xf32>
    %248 = arith.addf %229, %247 : vector<16x128xf32>
    %c0_81 = arith.constant 0 : index
    %c0_82 = arith.constant 0 : index
    %c0_83 = arith.constant 0 : index
    %249 = vector.load %arg13[%c0_81, %c0_82, %c0_83] : memref<1x1x128xf32, #tpu.memory_space<vmem>>, vector<1x1x128xf32>
    %250 = vector.shape_cast %249 : vector<1x1x128xf32> to vector<1x128xf32>
    %c0_84 = arith.constant 0 : index
    %c0_85 = arith.constant 0 : index
    %c0_86 = arith.constant 0 : index
    %251 = vector.load %arg14[%c0_84, %c0_85, %c0_86] : memref<1x1x128xf32, #tpu.memory_space<vmem>>, vector<1x1x128xf32>
    %252 = vector.shape_cast %251 : vector<1x1x128xf32> to vector<1x128xf32>
    %cst_87 = arith.constant dense<0.000000e+00> : vector<16xf32>
    %253 = vector.multi_reduction <add>, %248, %cst_87 [1] : vector<16x128xf32> to vector<16xf32>
    %254 = vector.shape_cast %253 : vector<16xf32> to vector<16x1xf32>
    %cst_88 = arith.constant 0.010416667 : f32
    %255 = vector.broadcast %cst_88 : f32 to vector<16x1xf32>
    %256 = arith.mulf %254, %255 : vector<16x1xf32>
    %257 = arith.mulf %248, %248 : vector<16x128xf32>
    %cst_89 = arith.constant dense<0.000000e+00> : vector<16xf32>
    %258 = vector.multi_reduction <add>, %257, %cst_89 [1] : vector<16x128xf32> to vector<16xf32>
    %259 = vector.shape_cast %258 : vector<16xf32> to vector<16x1xf32>
    %cst_90 = arith.constant 0.010416667 : f32
    %260 = vector.broadcast %cst_90 : f32 to vector<16x1xf32>
    %261 = arith.mulf %259, %260 : vector<16x1xf32>
    %262 = arith.mulf %256, %256 : vector<16x1xf32>
    %263 = arith.subf %261, %262 : vector<16x1xf32>
    %264 = vector.broadcast %256 : vector<16x1xf32> to vector<16x128xf32>
    %265 = arith.subf %248, %264 : vector<16x128xf32>
    %cst_91 = arith.constant 9.99999974E-6 : f32
    %266 = vector.broadcast %cst_91 : f32 to vector<16x1xf32>
    %267 = arith.addf %263, %266 : vector<16x1xf32>
    %268 = math.rsqrt %267 : vector<16x1xf32>
    %269 = vector.broadcast %268 : vector<16x1xf32> to vector<16x128xf32>
    %270 = arith.mulf %265, %269 : vector<16x128xf32>
    %271 = vector.broadcast %250 : vector<1x128xf32> to vector<16x128xf32>
    %272 = arith.mulf %270, %271 : vector<16x128xf32>
    %273 = vector.broadcast %252 : vector<1x128xf32> to vector<16x128xf32>
    %274 = arith.addf %272, %273 : vector<16x128xf32>
    %c0_92 = arith.constant 0 : index
    %c0_93 = arith.constant 0 : index
    %275 = vector.load %arg16[%c0_92, %c0_93] : memref<16x128xf32, #tpu.memory_space<vmem>>, vector<16x128xf32>
    tpu.vector_store %arg16[%c0_92, %c0_93], %274 {strides = array<i32>} : memref<16x128xf32, #tpu.memory_space<vmem>>, vector<16x128xf32>,
    %c1_i32 = arith.constant 1 : i32
    %276 = arith.cmpi eq, %arg1, %c1_i32 : i32
    %277 = arith.extui %276 : i1 to i32
    %c0_i32_94 = arith.constant 0 : i32
    %278 = arith.cmpi ne, %277, %c0_i32_94 : i32
    scf.if %278 {
      %279 = vector.shape_cast %274 : vector<16x128xf32> to vector<2x8x128xf32>
      %c0_95 = arith.constant 0 : index
      %c0_96 = arith.constant 0 : index
      %c0_97 = arith.constant 0 : index
      %280 = vector.load %arg15[%c0_95, %c0_96, %c0_97] : memref<2x8x128xf32, #tpu.memory_space<vmem>>, vector<2x8x128xf32>
      tpu.vector_store %arg15[%c0_95, %c0_96, %c0_97], %279 {strides = array<i32>} : memref<2x8x128xf32, #tpu.memory_space<vmem>>, vector<2x8x128xf32>,
    } else {
    }
    return
  }
  func.func @transform_0(%arg0: i32, %arg1: i32) -> (i32, i32, i32) {
    %c0_i32 = arith.constant 0 : i32
    %c0_i32_0 = arith.constant 0 : i32
    %c0_i32_1 = arith.constant 0 : i32
    return %arg0, %c0_i32, %c0_i32_0 : i32, i32, i32
  }
  func.func @transform_1(%arg0: i32, %arg1: i32) -> (i32, i32, i32) {
    %c0_i32 = arith.constant 0 : i32
    %c0_i32_0 = arith.constant 0 : i32
    %c0_i32_1 = arith.constant 0 : i32
    return %arg1, %c0_i32, %c0_i32_0 : i32, i32, i32
  }
  func.func @transform_2(%arg0: i32, %arg1: i32) -> (i32, i32, i32) {
    %c0_i32 = arith.constant 0 : i32
    %c0_i32_0 = arith.constant 0 : i32
    %c0_i32_1 = arith.constant 0 : i32
    return %arg1, %c0_i32, %c0_i32_0 : i32, i32, i32
  }
  func.func @transform_3(%arg0: i32, %arg1: i32) -> (i32, i32, i32) {
    %c0_i32 = arith.constant 0 : i32
    %c0_i32_0 = arith.constant 0 : i32
    %c0_i32_1 = arith.constant 0 : i32
    return %arg1, %c0_i32, %c0_i32_0 : i32, i32, i32
  }
  func.func @transform_4(%arg0: i32, %arg1: i32) -> (i32, i32, i32) {
    %c0_i32 = arith.constant 0 : i32
    %c0_i32_0 = arith.constant 0 : i32
    %c0_i32_1 = arith.constant 0 : i32
    return %arg1, %c0_i32, %c0_i32_0 : i32, i32, i32
  }
  func.func @transform_5(%arg0: i32, %arg1: i32) -> (i32, i32, i32) {
    %c0_i32 = arith.constant 0 : i32
    %c0_i32_0 = arith.constant 0 : i32
    %c0_i32_1 = arith.constant 0 : i32
    return %arg1, %c0_i32, %c0_i32_0 : i32, i32, i32
  }
  func.func @transform_6(%arg0: i32, %arg1: i32) -> (i32, i32, i32) {
    %c0_i32 = arith.constant 0 : i32
    %c0_i32_0 = arith.constant 0 : i32
    %c0_i32_1 = arith.constant 0 : i32
    return %arg1, %c0_i32, %c0_i32_0 : i32, i32, i32
  }
  func.func @transform_7(%arg0: i32, %arg1: i32) -> (i32, i32, i32) {
    %c0_i32 = arith.constant 0 : i32
    %c0_i32_0 = arith.constant 0 : i32
    %c0_i32_1 = arith.constant 0 : i32
    return %arg1, %c0_i32, %c0_i32_0 : i32, i32, i32
  }
  func.func @transform_8(%arg0: i32, %arg1: i32) -> (i32, i32, i32) {
    %c0_i32 = arith.constant 0 : i32
    %c0_i32_0 = arith.constant 0 : i32
    %c0_i32_1 = arith.constant 0 : i32
    return %arg1, %c0_i32, %c0_i32_0 : i32, i32, i32
  }
  func.func @transform_9(%arg0: i32, %arg1: i32) -> (i32, i32, i32) {
    %c0_i32 = arith.constant 0 : i32
    %c0_i32_0 = arith.constant 0 : i32
    %c0_i32_1 = arith.constant 0 : i32
    return %arg1, %c0_i32, %c0_i32_0 : i32, i32, i32
  }
  func.func @transform_10(%arg0: i32, %arg1: i32) -> (i32, i32, i32) {
    %c0_i32 = arith.constant 0 : i32
    %c0_i32_0 = arith.constant 0 : i32
    %c0_i32_1 = arith.constant 0 : i32
    return %arg1, %c0_i32, %c0_i32_0 : i32, i32, i32
  }
  func.func @transform_11(%arg0: i32, %arg1: i32) -> (i32, i32, i32) {
    %c0_i32 = arith.constant 0 : i32
    %c0_i32_0 = arith.constant 0 : i32
    %c0_i32_1 = arith.constant 0 : i32
    return %arg1, %c0_i32, %c0_i32_0 : i32, i32, i32
  }
  func.func @transform_12(%arg0: i32, %arg1: i32) -> (i32, i32, i32) {
    %c0_i32 = arith.constant 0 : i32
    %c0_i32_0 = arith.constant 0 : i32
    %c0_i32_1 = arith.constant 0 : i32
    return %arg1, %c0_i32, %c0_i32_0 : i32, i32, i32
  }
  func.func @transform_13(%arg0: i32, %arg1: i32) -> (i32, i32, i32) {
    %c0_i32 = arith.constant 0 : i32
    %c0_i32_0 = arith.constant 0 : i32
    %c0_i32_1 = arith.constant 0 : i32
    return %arg0, %c0_i32, %c0_i32_0 : i32, i32, i32
  }
}

</mosaic_0001>

<bundles_post_ra>
// kernel: tpu_custom_call.1
= control target key start
LH: loop header
LB: loop body
LE: loop exit
PB: predicated region body
PF: predicated region fallthrough
CT: control target
= control target key end

     0   :  { %s5908_s0 = inlined_call_operand.hbm [shape: f32[2,8,128], index: 0, kind: input, shape index: {}]   ;;  %s5909_s1 = inlined_call_operand.hbm [shape: bf16[2,128,384], index: 1, kind: input, shape index: {}]   ;;  %s5910_s2 = inlined_call_operand.hbm [shape: f32[2,1,384], index: 2, kind: input, shape index: {}]   ;;  %s5911_s3 = inlined_call_operand.hbm [shape: bf16[2,128,128], index: 3, kind: input, shape index: {}]   ;;  %s5912_s4 = inlined_call_operand.vmem [shape: f32[2,1,128], index: 4, kind: input, shape index: {}]   ;;  %s5913_s5 = inlined_call_operand.vmem [shape: f32[2,1,128], index: 5, kind: input, shape index: {}]   ;;  %s5914_s6 = inlined_call_operand.vmem [shape: f32[2,1,128], index: 6, kind: input, shape index: {}]   ;;  %s5915_s7 = inlined_call_operand.hbm [shape: bf16[2,128,384], index: 7, kind: input, shape index: {}]   ;;  %s5916_s8 = inlined_call_operand.vmem [shape: f32[2,1,384], index: 8, kind: input, shape index: {}]   ;;  %s5917_s9 = inlined_call_operand.hbm [shape: bf16[2,384,128], index: 9, kind: input, shape index: {}]   ;;  %s5918_s10 = inlined_call_operand.vmem [shape: f32[2,1,128], index: 10, kind: input, shape index: {}]   ;;  %s5919_s11 = inlined_call_operand.vmem [shape: f32[2,1,128], index: 11, kind: input, shape index: {}]   ;;  %s5920_s12 = inlined_call_operand.vmem [shape: f32[2,1,128], index: 12, kind: input, shape index: {}]   ;;  %s5921_s13 = inlined_call_operand.hbm [shape: f32[2,8,128], index: 13, kind: output, shape index: {}]  }
   0x1   :  { %5930 = sst [smem:[#allocation25_spill]] %s5908_s0 }
   0x2   :  { %5931 = sst [smem:[#allocation26_spill]] %s5909_s1 }
   0x3   :  { %5932 = sst [smem:[#allocation27_spill]] %s5910_s2 }
   0x4   :  { %5933 = sst [smem:[#allocation28_spill]] %s5911_s3 }
   0x5   :  { %5934 = sst [smem:[#allocation29_spill]] %s5912_s4 }
   0x6   :  { %5935 = sst [smem:[#allocation30_spill]] %s5913_s5 }
   0x7   :  { %5936 = sst [smem:[#allocation31_spill]] %s5914_s6 }
   0x8   :  { %5937 = sst [smem:[#allocation32_spill]] %s5915_s7 }
   0x9   :  { %5938 = sst [smem:[#allocation33_spill]] %s5916_s8 }
   0xa   :  { %5939 = sst [smem:[#allocation34_spill]] %s5917_s9 }
   0xb   :  { %5940 = sst [smem:[#allocation35_spill]] %s5918_s10 }
   0xc   :  { %5941 = sst [smem:[#allocation36_spill]] %s5919_s11 }
   0xd   :  { %5942 = sst [smem:[#allocation37_spill]] %s5920_s12 }
   0xe   :  { %5943 = sst [smem:[#allocation38_spill]] %s5921_s13 }
   0xf   :  { %18 = vsyncpa [#allocation4], 0 }
  0x10   :  { %19 = vsyncpa [#allocation7], 0 }
  0x11   :  { %21 = vsyncpa [#allocation7 + $0x1], 0 }
  0x12   :  { %22 = vsyncpa [#allocation10], 0 }
  0x13   :  { %24 = vsyncpa [#allocation10 + $0x1], 0 }
  0x14   :  { %25 = vsyncpa [#allocation13], 0 }
  0x15   :  { %27 = vsyncpa [#allocation13 + $0x1], 0 }
  0x16   :  { %28 = vsyncpa [#allocation5], 0  ;;  %s5087_s25 = smov 0   ;;  %s5089_s26 = smov 0  }
  0x17   :  { %s5091_s27 = smov 0   ;;  %s5093_s28 = smov 0  }
  0x18   :  { %s5095_s29 = smov 0   ;;  %s5097_s30 = smov 0  }
  0x19 LB: > { %5944 = sst [smem:[#allocation20_spill]] %s4978_s27  ;;  %s43_s14 = sadd.s32 1, %s4986_s29  ;;  %s4990_s30 = sphi %s5097_s30, %s34_s30   ;;  %s4986_s29 = sphi %s5095_s29, %s5988_s29   ;;  %s4982_s28 = sphi %s5093_s28, %s5987_s28   ;;  %s4978_s27 = sphi %s5091_s27, %s5986_s27   ;;  %s4974_s26 = sphi %s5089_s26, %s5990_s26   ;;  %s4970_s25 = sphi %s5087_s25, %s5989_s25  }
  0x1a   : > { %5945 = sst [smem:[#allocation21_spill]] %s4982_s28  ;;  %s79_s15 = sadd.s32 1, %s4978_s27 }
  0x1b   : > { %5946 = sst [smem:[#allocation22_spill]] %s4986_s29  ;;  %p44_p0 = scmp.ge.s32.totalorder %s43_s14, 2 }
  0x1c   : > { %p86_p1 = scmp.ne.s32.totalorder %s4978_s27, %s4974_s26  ;;  %p87_p2 = scmp.eq.s32.totalorder %s4990_s30, 0 }
  0x1d   : > { %s5992_s14 = smov (%p44_p0, %s43_s14), 0  ;;  %p4457_p4 = scmp.lt.s32.totalorder %s4990_s30, 2 }
  0x1e   : > { %5947 = sst [smem:[#allocation23_spill]] %s5992_s14  ;;  %p88_p3 = por %p87_p2, %p86_p1 }
  0x1f   : > { %s76_s16 = ssub.s32 %s4986_s29, %s5992_s14  ;;  %s5129_s18 = sand.u32 1, %s4978_s27  }
  0x20   : > { %p77_p5 = scmp.eq.s32.totalorder %s76_s16, 0  ;;  %s5132_s19 = smul.u32 3072, %s4986_s29 }
  0x21   : > { %s5138_s21 = smul.u32 192, %s5129_s18  ;;  %s5949_s1 = sld [smem:[#allocation26_spill]] }
  0x22   : > { %s5135_s20 = scalar_select %p77_p5, %s4978_s27, %s79_s15  }
  0x23   : > { %p5144_p6 = pnand %p4457_p4, %p88_p3  ;;  %s448_s16 = scalar_lea.vmem [#allocation6], %s5138_s21 }
  0x24   : > { %5948 = sst [smem:[#allocation24_spill]] %s5135_s20  ;;  %s455_s17 = sshll.u32 %s448_s16, 4  ;;  %s456_s17 = int_to_ptr.vmem [resolvable:$true] %s455_s17 }
  0x25   : > { %s5951_s14 = sand.u32 1, %s4990_s30   ;;  %p5155_p7 = pneg %p5144_p6 }
  0x26   : > { %s5151_s12 = scalar_lea.sflag [#allocation7], %s5951_s14  ;;  %s4747_s22 = scalar_lea.vmem %s456_s17, 3072 }
  0x27   : > { %s454_s24 = scalar_lea.hbm %s5949_s1, %s5132_s19  ;;  %p4748_p8 = scmp.ne.s32.totalorder %s456_s17, %s4747_s22 }
  0x28   : > { %s4992_s23 = smov [#allocation6]  }
  0x29   : > { %p4750_p9 = pnand %p4748_p8, %p5155_p7  ;;  %s4752_s1 = sshll.u32 %s4992_s23, 4  ;;  %s4753_s1 = int_to_ptr.vmem [resolvable:$false] %s4752_s1 }
  0x2a   : > { %s4754_s20 = scalar_lea.vmem %s4753_s1, 6144  ;;  %p4755_p11 = scmp.lt.s32.totalorder %s456_s17, %s4753_s1 }
  0x2b   : > { %p4751_p10 = pneg %p4750_p9  ;;  %p4756_p12 = scmp.lt.s32.totalorder %s4754_s20, %s4747_s22 }
  0x2d   : > { %p4757_p13 = por %p4756_p12, %p4755_p11 }
  0x2f   : > { %p4758_p0 = pnand %p4757_p13, %p4751_p10 }
  0x31   : > { %4761 = shalt.err (!%p4758_p0)
}
  0x32   : > { %s5927_s14 = smov 192   ;;  %s5928_s16 = smov 12  }
  0x33   : > { %4443 = dma.hbm_to_vmem [thread:$0]  (!%p5144_p6), %s454_s24, 3072, %s456_s17, %s5151_s12, %s5927_s14, %s5927_s14, %s5928_s16  }
  0x34   : > { %s3880_s23 = sshll.u32 %s5129_s18, 6  ;;  %s4012_s27 = sshll.u32 %s4986_s29, 10 }
  0x35   : > { %s5953_s3 = sld [smem:[#allocation28_spill]]  ;;  %s488_s8 = scalar_lea.vmem [#allocation9], %s3880_s23 }
  0x36   : > { %s495_s11 = sshll.u32 %s488_s8, 4  ;;  %s5954_s10 = sand.u32 1, %s4990_s30   ;;  %s496_s11 = int_to_ptr.vmem [resolvable:$true] %s495_s11 }
  0x37   : > { %s5174_s6 = scalar_lea.sflag [#allocation10], %s5954_s10  ;;  %s4775_s5 = scalar_lea.vmem %s496_s11, 1024 }
  0x38   : > { %p4776_p1 = scmp.ne.s32.totalorder %s496_s11, %s4775_s5  ;;  %s4995_s4 = smov [#allocation9]  }
  0x39   : > { %s4780_s28 = sshll.u32 %s4995_s4, 4  ;;  %s4781_s28 = int_to_ptr.vmem [resolvable:$false] %s4780_s28 }
  0x3a   : > { %p4778_p2 = pnand %p4776_p1, %p5155_p7  ;;  %s4782_s17 = scalar_lea.vmem %s4781_s28, 2048 }
  0x3b   : > { %s494_s22 = scalar_lea.hbm %s5953_s3, %s4012_s27  ;;  %p4783_p4 = scmp.lt.s32.totalorder %s496_s11, %s4781_s28 }
  0x3c   : > { %p4779_p3 = pneg %p4778_p2  ;;  %p4784_p5 = scmp.lt.s32.totalorder %s4782_s17, %s4775_s5 }
  0x3e   : > { %p4785_p8 = por %p4784_p5, %p4783_p4 }
  0x40   : > { %p4786_p9 = pnand %p4785_p8, %p4779_p3 }
  0x42   : > { %4789 = shalt.err (!%p4786_p9)
}
  0x43   : > { %s5925_s27 = smov 64   ;;  %s5926_s8 = smov 4  }
  0x44   : > { %4449 = dma.hbm_to_vmem [thread:$0]  (!%p5144_p6), %s494_s22, 1024, %s496_s11, %s5174_s6, %s5925_s27, %s5925_s27, %s5926_s8  }
  0x45   : > { %s5185_s4 = sadd.s32 4294967295, %s4990_s30   ;;  %p92_p10 = scmp.ne.s32.totalorder %s4974_s26, %s4970_s25 }
  0x46   : > { %p93_p11 = scmp.eq.s32.totalorder %s5185_s4, 0  ;;  %p3875_p12 = scmp.ge.s32.totalorder %s4990_s30, 1 }
  0x47   : > { %p415_p13 = scmp.lt.s32.totalorder %s4990_s30, 3  ;;  %s4998_s11 = smov [#allocation3]  }
  0x48   : > { %p5194_p0 = por %p93_p11, %p92_p10  ;;  %s430_s28 = sshll.u32 %s4998_s11, 4  ;;  %s431_s28 = int_to_ptr.vmem [resolvable:$true] %s430_s28 }
  0x49   : > { %p5198_p1 = pnand %p3875_p12, %p415_p13  ;;  %s4409_s24 = smul.u32 3, %s5129_s18 }
  0x4a   : > { %s4410_s23 = smul.u32 48, %s4986_s29  ;;  %s5958_s7 = sld [smem:[#allocation32_spill]] }
  0x4b   : > { %p4436_p2 = pneg %p5198_p1  ;;  %s5959_s2 = sld [smem:[#allocation27_spill]] }
  0x4c   : > { %s4801_s11 = scalar_lea.vmem %s431_s28, 256  ;;  %p4809_p10 = scmp.lt.s32.totalorder %s431_s28, %s431_s28 }
  0x4d   : > { %p5207_p3 = pnand %p4436_p2, %p93_p11  ;;  %p4802_p5 = scmp.ne.s32.totalorder %s431_s28, %s4801_s11 }
  0x4e   : > { %p4810_p12 = scmp.lt.s32.totalorder %s4801_s11, %s4801_s11 }
  0x4f   : > { %p4792_p4 = pneg %p5207_p3 }
  0x50   : > { %p4811_p13 = por %p4810_p12, %p4809_p10 }
  0x51   : > { %s5219_s8 = scalar_lea.hbm %s5959_s2, %s4410_s23  ;;  %p4804_p8 = pnand %p4802_p5, %p4792_p4 }
  0x53   : > { %p4805_p9 = pneg %p4804_p8 }
  0x55   : > { %p4812_p2 = pnand %p4811_p13, %p4805_p9 }
  0x57   : > { %4815 = shalt.err (!%p4812_p2)
}
  0x58   : > { %s4999_s14 = smov 128   ;;  %s5000_s1 = smov 8  }
  0x59   : > { %s5960_s0 = sld [smem:[#allocation25_spill]]  ;;  %s469_s20 = scalar_lea.vmem [#allocation8], %s4409_s24 }
  0x5a   : > { %s477_s17 = sshll.u32 %s469_s20, 4  ;;  %s527_s22 = scalar_lea.vmem [#allocation11], %s5138_s21  ;;  %s478_s17 = int_to_ptr.vmem [resolvable:$true] %s477_s17 }
  0x5b   : > { %s534_s16 = sshll.u32 %s527_s22, 4  ;;  %s4829_s11 = scalar_lea.vmem %s478_s17, 48  ;;  %s5229_s16 = int_to_ptr.vmem [resolvable:$true] %s534_s16 }
  0x5c   : > { %p4830_p4 = scmp.ne.s32.totalorder %s478_s17, %s4829_s11  ;;  %s5001_s2 = smov [#allocation8]  }
  0x5d   : > { %s4834_s3 = sshll.u32 %s5001_s2, 4  ;;  %s4835_s3 = int_to_ptr.vmem [resolvable:$false] %s4834_s3 }
  0x5e   : > { %p4832_p5 = pnand %p4830_p4, %p5155_p7  ;;  %s4836_s25 = scalar_lea.vmem %s4835_s3, 96 }
  0x5f   : > { %4439 = dma.hbm_to_vmem [thread:$0]  (!%p5207_p3), %s5960_s0, 256, %s431_s28, [#allocation4], %s4999_s14, %s4999_s14, %s5000_s1  }
  0x60   : > { %p4833_p8 = pneg %p4832_p5  ;;  %p4837_p9 = scmp.lt.s32.totalorder %s478_s17, %s4835_s3 }
  0x61   : > { %p4838_p10 = scmp.lt.s32.totalorder %s4836_s25, %s4829_s11 }
  0x63   : > { %p4839_p12 = por %p4838_p10, %p4837_p9 }
  0x65   : > { %p4840_p3 = pnand %p4839_p12, %p4833_p8 }
  0x67   : > { %4843 = shalt.err (!%p4840_p3)
}
  0x68   : > { %4446 = dma.hbm_to_vmem [thread:$0]  (!%p5144_p6), %s5219_s8, 48, %s478_s17, %s5151_s12  }
  0x69   : > { %s4857_s14 = scalar_lea.vmem %s5229_s16, 3072  ;;  %s5002_s2 = smov [#allocation11]  }
  0x6a   : > { %p4858_p13 = scmp.ne.s32.totalorder %s5229_s16, %s4857_s14  ;;  %s4862_s3 = sshll.u32 %s5002_s2, 4  ;;  %s4863_s3 = int_to_ptr.vmem [resolvable:$false] %s4862_s3 }
  0x6b   : > { %s4864_s28 = scalar_lea.vmem %s4863_s3, 6144  ;;  %p4865_p5 = scmp.lt.s32.totalorder %s5229_s16, %s4863_s3 }
  0x6c   : > { %p4860_p2 = pnand %p4858_p13, %p5155_p7  ;;  %p4866_p8 = scmp.lt.s32.totalorder %s4864_s28, %s4857_s14 }
  0x6e   : > { %p4861_p4 = pneg %p4860_p2  ;;  %p4867_p9 = por %p4866_p8, %p4865_p5 }
  0x70   : > { %p4868_p10 = pnand %p4867_p9, %p4861_p4 }
  0x72   : > { %4871 = shalt.err (!%p4868_p10)
}
  0x73   : > { %s5961_s24 = smov 12   ;;  %s5962_s22 = smov 192  }
  0x74   : > { %s5963_s1 = scalar_lea.hbm %s5958_s7, %s5132_s19  ;;  %s5964_s9 = sld [smem:[#allocation34_spill]] }
  0x75   : > { %4452 = dma.hbm_to_vmem [thread:$0]  (!%p5144_p6), %s5963_s1, 3072, %s5229_s16, %s5174_s6, %s5962_s22, %s5962_s22, %s5961_s24  }
  0x76   : > { %s555_s17 = scalar_lea.vmem [#allocation12], %s5138_s21  ;;  %s552_s25 = scalar_lea.sflag [#allocation13], %s5129_s18 }
  0x77   : > { %s562_s11 = sshll.u32 %s555_s17, 4  ;;  %s5003_s2 = smov [#allocation12]   ;;  %s563_s11 = int_to_ptr.vmem [resolvable:$true] %s562_s11 }
  0x78   : > { %s4885_s14 = scalar_lea.vmem %s563_s11, 3072  ;;  %s4890_s3 = sshll.u32 %s5003_s2, 4  ;;  %s4891_s3 = int_to_ptr.vmem [resolvable:$false] %s4890_s3 }
  0x79   : > { %p4886_p12 = scmp.ne.s32.totalorder %s563_s11, %s4885_s14  ;;  %s4892_s28 = scalar_lea.vmem %s4891_s3, 6144 }
  0x7a   : > { %s561_s20 = scalar_lea.hbm %s5964_s9, %s5132_s19  ;;  %p4893_p2 = scmp.lt.s32.totalorder %s563_s11, %s4891_s3 }
  0x7b   : > { %p4888_p3 = pnand %p4886_p12, %p5155_p7  ;;  %p4894_p4 = scmp.lt.s32.totalorder %s4892_s28, %s4885_s14 }
  0x7d   : > { %p4889_p13 = pneg %p4888_p3  ;;  %p4895_p5 = por %p4894_p4, %p4893_p2 }
  0x7f   : > { %p4896_p8 = pnand %p4895_p5, %p4889_p13 }
  0x81   : > { %4899 = shalt.err (!%p4896_p8)
}
  0x82   : > { %s5965_s6 = smov 4   ;;  %s5966_s19 = smov 64  }
  0x83   : > { %4455 = dma.hbm_to_vmem [thread:$0]  (!%p5144_p6), %s561_s20, 3072, %s563_s11, %s552_s25, %s5966_s19, %s5966_s19, %s5965_s6  }
  0x84   : > { %592 = sbr.rel (%p5198_p1) target bundleno = 5881 (0x16f9), region = 72 }
  0x89   : > { %4949 = dma.done.wait (%p93_p11), [#allocation4], 256  }
  0x8a   : > { %4951 = vsyncadd (%p93_p11), [#allocation4], 4294967040  ;;  %s598_s18 = sand.u32 1, %s5185_s4   ;;  %s600_s21 = sand.u32 1, %s4974_s26  }
  0x8b   : > { %s4415_s15 = smul.u32 192, %s600_s21  ;;  %s599_s13 = scalar_lea.sflag [#allocation7], %s598_s18 }
  0x8d   : > { %s5275_s16 = scalar_lea.vmem [#allocation6], %s4415_s15 }
  0x8e   : > { %4953 = dma.done.wait (%p5194_p0), %s599_s13, 3120  }
  0x8f   : > { %4955 = vsyncadd (%p5194_p0), %s599_s13, 4294964176  ;;  %s4416_s10 = smul.u32 3, %s600_s21  ;;  %s3887_s24 = sshll.u32 %s600_s21, 6 }
  0x90   : > { %s617_s12 = scalar_lea.sflag [#allocation10], %s598_s18  ;;  %s5283_s8 = scalar_lea.vmem [#allocation9], %s3887_s24 }
  0x91   : > { %s5281_s22 = scalar_lea.vmem [#allocation8], %s4416_s10 }
  0x92   : > { %4957 = dma.done.wait (%p5194_p0), %s617_s12, 4096  }
  0x93   : > { %4959 = vsyncadd (%p5194_p0), %s617_s12, 4294963200  ;;  %s5289_s1 = scalar_lea.vmem [#allocation11], %s4415_s15  ;;  %s635_s27 = scalar_lea.sflag [#allocation13], %s600_s21 }
  0x94   : > { %s5291_s23 = scalar_lea.vmem [#allocation12], %s4415_s15 }
  0x95   : > { %4961 = dma.done.wait (%p5194_p0), %s635_s27, 3072  }
  0x96   : > { %4963 = vsyncadd (%p5194_p0), %s635_s27, 4294964224  ;;  %s5967_s20 = sld [smem:[#allocation21_spill]] }
  0x97   : > { %s5970_s21 = sld [smem:[#allocation31_spill]] }
  0x98   : > { %s5971_s12 = sld [smem:[#allocation35_spill]] }
  0x99   : > { %s5972_s0 = sld [smem:[#allocation36_spill]] }
  0x9a   : > { %s5973_s14 = sld [smem:[#allocation33_spill]] }
  0x9b   : > { %s5974_s5 = sld [smem:[#allocation37_spill]] }
  0x9c   : > { %p719_p6 = scmp.lt.s32.totalorder %s5967_s20, 1  ;;  %p3888_p7 = scmp.ne.s32.totalorder %s5967_s20, 0 }
  0x9e   : > { %s5299_s17 = scalar_select %p719_p6, %s5967_s20, 1 }
  0x9f   : > { %746 = sbr.rel (%p3888_p7) target bundleno = 166 (0xa6), region = 100 }
  0xa0   : > { %s727_s15 = scalar_lea.vmem %s5970_s21, %s5299_s17  ;;  %s4417_s13 = smul.u32 3, %s5299_s17 }
  0xa1   : > { %s734_s27 = scalar_lea.vmem %s5971_s12, %s5299_s17  ;;  %s737_s7 = scalar_lea.vmem %s5972_s0, %s5299_s17 }
  0xa2   : > { %s5325_s2 = scalar_lea.vmem %s5973_s14, %s4417_s13  ;;  %s740_s6 = scalar_lea.vmem %s5974_s5, %s5299_s17 }
  0xa4   : > { %v747_v0 = vld [vmem:[#allocation3] sm:$0xff]  ;;  %v748_v1 = vld [vmem:[#allocation3 + $0x8] sm:$0xff] }
  0xa5   : > { %749 = vst [vmem:[#allocation2] sm:$0xff] %v747_v0  ;;  %750 = vst [vmem:[#allocation2 + $0x8] sm:$0xff] %v748_v1 }
  0xa6 PF: > { %v4564_v2 = vld [vmem:[%s5275_s16 + $0xac] ss:$12 sps:$4 sm:$0xff]   ;;  %v4566_v3 = vld [vmem:[%s5275_s16 + $0xa8] ss:$12 sps:$4 sm:$0xff]   ;;  %v5004_v4 = vmov 0   ;;  %v5005_v5 = vmov 0.0   ;;  %v788_v31 = vlaneseq }
  0xa7   : > { %963 = vmatprep.mubr.bf16.mxu0 %v5004_v4  ;;  %4135 = vmatprep.subr.bf16.mxu1 %v5005_v5  ;;  %v4567_v6 = vld [vmem:[%s5275_s16 + $0x94] ss:$12 sps:$4 sm:$0xff]   ;;  %v4569_v7 = vld [vmem:[%s5275_s16 + $0x90] ss:$12 sps:$4 sm:$0xff]   ;;  %v4572_v9 = vld [vmem:[%s5275_s16 + $0x78] ss:$12 sps:$4 sm:$0xff]  }
  0xa8   : > { %931 = vmatprep.subr.bf16.mxu0 %v4564_v2  ;;  %v4570_v8 = vld [vmem:[%s5275_s16 + $0x7c] ss:$12 sps:$4 sm:$0xff]   ;;  %v4573_v10 = vld [vmem:[%s5275_s16 + $0x64] ss:$12 sps:$4 sm:$0xff]   ;;  %v4575_v11 = vld [vmem:[%s5275_s16 + $0x60] ss:$12 sps:$4 sm:$0xff]  }
  0xa9   : > { %932 = vmatpush1.bf16.msra.mxu0 %v4566_v3  ;;  %v4576_v12 = vld [vmem:[%s5275_s16 + $0x4c] ss:$12 sps:$4 sm:$0xff]   ;;  %v4588_v13 = vld [vmem:[%s5275_s16 + $0xb0] ss:$12 sps:$4 sm:$0xff]   ;;  %v4578_v15 = vld [vmem:[%s5275_s16 + $0x48] ss:$12 sps:$4 sm:$0xff]  }
  0xaa   : > { %933 = vmatprep.subr.bf16.mxu0 %v4567_v6  ;;  %4136 = vmatpush3.bf16.msra.mxu1 %v4588_v13  ;;  %v4589_v14 = vld [vmem:[%s5275_s16 + $0x98] ss:$12 sps:$4 sm:$0xff]   ;;  %v4579_v16 = vld [vmem:[%s5275_s16 + $0x34] ss:$12 sps:$4 sm:$0xff]   ;;  %v4581_v18 = vld [vmem:[%s5275_s16 + $0x30] ss:$12 sps:$4 sm:$0xff]  }
  0xab   : > { %4137 = vmatprep.subr.bf16.mxu1 %v5005_v5  ;;  %v4590_v17 = vld [vmem:[%s5275_s16 + $0x80] ss:$12 sps:$4 sm:$0xff]   ;;  %v4582_v19 = vld [vmem:[%s5275_s16 + $0x1c] ss:$12 sps:$4 sm:$0xff]   ;;  %v4584_v21 = vld [vmem:[%s5275_s16 + $0x18] ss:$12 sps:$4 sm:$0xff]  }
  0xac   : > { %v4591_v20 = vld [vmem:[%s5275_s16 + $0x68] ss:$12 sps:$4 sm:$0xff]   ;;  %v4585_v22 = vld [vmem:[%s5275_s16 + $0x4] ss:$12 sps:$4 sm:$0xff]   ;;  %v4587_v24 = vld [vmem:[%s5275_s16] ss:$12 sps:$4 sm:$0xff]  }
  0xad   : > { %934 = vmatpush1.bf16.msra.mxu0 %v4569_v7  ;;  %v4592_v23 = vld [vmem:[%s5275_s16 + $0x50] ss:$12 sps:$4 sm:$0xff]   ;;  %v751_v25 = vld [vmem:[#allocation2] sm:$0xff]  ;;  %v752_v26 = vld [vmem:[#allocation2 + $0x8] sm:$0xff]  ;;  %vm5006_vm0 = vmmov 0   ;;  %v5373_v32 = vshrl.u32 %v788_v31, 7 }
  0xae   : > { %935 = vmatprep.subr.bf16.mxu0 %v4570_v8  ;;  %4138 = vmatpush3.bf16.msra.mxu1 %v4589_v14  ;;  %v4593_v27 = vld [vmem:[%s5275_s16 + $0x38] ss:$12 sps:$4 sm:$0xff]   ;;  %v753_v28 = vpack.c.bf16 %v752_v26, %v751_v25  ;;  %v4594_v29 = vld [vmem:[%s5275_s16 + $0x20] ss:$12 sps:$4 sm:$0xff]   ;;  %v4595_v30 = vld [vmem:[%s5275_s16 + $0x8] ss:$12 sps:$4 sm:$0xff]  }
  0xaf   : > { %4139 = vmatprep.subr.bf16.mxu1 %v5005_v5  ;;  %4151 = vmatprep.mubr.msk.bf16.mxu1 %vm5006_vm0, %v5005_v5  ;;  %v794_v33 = vsub.s32 1, %v5373_v32  ;;  %v786_v34 = vld [vmem:[%s5281_s22] sm:$0x7]  ;;  %v790_v37 = vsub.s32 0, %v5373_v32  ;;  %vm1021_vm1 = vcmask 130048   ;;  %v798_v52 = vsub.s32 2, %v5373_v32 }
  0xb0   : > { %vm1144_vm2 = vcmask 1043456   ;;  %vm1116_vm3 = vcmask 64512   ;;  %s5007_s0 = smov 112   ;;  %s5008_s9 = smov 96   ;;  %vm2852_vm4 = vcmask 261120   ;;  %vm2855_vm5 = vcmask 392192  }
  0xb1   : > { %936 = vmatpush1.bf16.msra.mxu0 %v4572_v9  ;;  %v795_v35 = vrot.slane %v786_v34, %v794_v33  ;;  %v791_v41 = vrot.slane %v786_v34, %v790_v37  ;;  %v799_v53 = vrot.slane %v786_v34, %v798_v52  ;;  %s5009_s29 = smov 80   ;;  %s5010_s16 = smov 64   ;;  %vm2858_vm6 = vcmask 523264  }
  0xb2   : > { %937 = vmatprep.subr.bf16.mxu0 %v4573_v10  ;;  %4140 = vmatpush3.bf16.msra.mxu1 %v4590_v17  ;;  %s5011_s22 = smov 48   ;;  %s5012_s20 = smov 32   ;;  %vm2861_vm7 = vcmask 654336   ;;  %vm2864_vm8 = vcmask 785408   ;;  %vm2867_vm9 = vcmask 916480  }
  0xb3   : > { %4141 = vmatprep.subr.bf16.mxu1 %v5005_v5  ;;  %s5013_s19 = smov 16   ;;  %s5975_s21 = sld [smem:[#allocation29_spill]] }
  0xb4   : > { %s5977_s24 = sld [smem:[#allocation30_spill]] }
  0xb5   : > { %938 = vmatpush1.bf16.msra.mxu0 %v4575_v11 }
  0xb6   : > { %939 = vmatprep.subr.bf16.mxu0 %v4576_v12  ;;  %4142 = vmatpush3.bf16.msra.mxu1 %v4591_v20 }
  0xb7   : > { %4143 = vmatprep.subr.bf16.mxu1 %v5005_v5 }
  0xb9   : > { %940 = vmatpush1.bf16.msra.mxu0 %v4578_v15  ;;  %s5976_s13 = scalar_lea.vmem %s5975_s21, %s5299_s17 }
  0xba   : > { %941 = vmatprep.subr.bf16.mxu0 %v4579_v16  ;;  %4144 = vmatpush3.bf16.msra.mxu1 %v4592_v23  ;;  %s5978_s12 = scalar_lea.vmem %s5977_s24, %s5299_s17 }
  0xbb   : > { %4145 = vmatprep.subr.bf16.mxu1 %v5005_v5 }
  0xbd   : > { %942 = vmatpush1.bf16.msra.mxu0 %v4581_v18 }
  0xbe   : > { %943 = vmatprep.subr.bf16.mxu0 %v4582_v19  ;;  %4146 = vmatpush3.bf16.msra.mxu1 %v4593_v27 }
  0xbf   : > { %4147 = vmatprep.subr.bf16.mxu1 %v5005_v5 }
  0xc1   : > { %944 = vmatpush1.bf16.msra.mxu0 %v4584_v21 }
  0xc2   : > { %945 = vmatprep.subr.bf16.mxu0 %v4585_v22  ;;  %4148 = vmatpush3.bf16.msra.mxu1 %v4594_v29 }
  0xc3   : > { %4149 = vmatprep.subr.bf16.mxu1 %v5005_v5 }
  0xc5   : > { %946 = vmatpush1.bf16.msra.mxu0 %v4587_v24 }
  0xc6   : > { %4179 = vmatprep.subr.bf16.mxu0 %v5005_v5  ;;  %4150 = vmatpush3.bf16.msra.mxu1 %v4595_v30 }
  0xc7   : > { %4155 = vmatprep.subr.bf16.mxu1 %v5005_v5 }
  0xc8   : > { %964 = vmatmul.mubr.bf16.vlgmr.msra.gmra.mxu0 %v753_v28 }
  0xc9   : > { %4181 = vmatprep.mubr.msk.bf16.mxu0 %vm5006_vm0, %v5005_v5  ;;  %4152 = vmatmul.mubr.bf16.vlgmr.msra.gmra.mxu1 %v753_v28 }
  0xca   : > { %4157 = vmatprep.mubr.msk.bf16.mxu1 %vm5006_vm0, %v5005_v5 }
 0x188   : > { %v965_v36 = vpop.f32.mrf.mxu0 }
 0x189   : > { %v966_v46 = vadd.f32 %v965_v36, %v791_v41  ;;  %v1008_v54 = vpop.f32.mrf.mxu1 }
 0x18a   : > { %v967_v38 = vpop.f32.mrf.mxu0  ;;  %v1009_v55 = vadd.f32 %v1008_v54, %v799_v53 }
 0x18b   : > { %v968_v39 = vadd.f32 %v967_v38, %v795_v35  ;;  %v5389_v48 = vpack.c.bf16 %v966_v46, %v966_v46  ;;  %v4153_v56 = vpop.f32.mrf.mxu1 }
 0x18c   : > { %v969_v40 = vpop.f32.mrf.mxu0  ;;  %v5407_v57 = vpack.c.bf16 %v1009_v55, %v1009_v55 }
 0x18d   : > { %v5382_v42 = vpack.c.bf16 %v968_v39, %v968_v39  ;;  %v970_v50 = vadd.f32 %v969_v40, %v791_v41  ;;  %v1011_v58 = vpop.f32.mrf.mxu1 }
 0x18e   : > { %v971_v43 = vpop.f32.mrf.mxu0  ;;  %v1012_v59 = vadd.f32 %v1011_v58, %v799_v53  ;;  %v1146_v60 = vsel %vm1144_vm2, %v5407_v57, 0 }
 0x18f   : > { %v972_v44 = vadd.f32 %v971_v43, %v795_v35  ;;  %v1026_v45 = vsel %vm1021_vm1, %v5382_v42, 0  ;;  %v5398_v51 = vpack.c.bf16 %v970_v50, %v970_v50  ;;  %v4154_v61 = vpop.f32.mrf.mxu1 }
 0x190   : > { %4156 = vmatpush3.bf16.xpose.msra.mxu1 %v1026_v45  ;;  %v5426_v26 = vpack.c.bf16 %v1012_v59, %v1012_v59 }
 0x191   : > { %4161 = vmatprep.subr.bf16.mxu1 %v5005_v5  ;;  %v5387_v47 = vpack.c.bf16 %v972_v44, %v972_v44 }
 0x192   : > { %v1192_v29 = vsel %vm1144_vm2, %v5426_v26, 0 }
 0x193   : > { %v1072_v49 = vsel %vm1021_vm1, %v5387_v47, 0 }
 0x197   : > { %4158 = vmatmul.mubr.msk.bf16.vlgmr.msra.gmra.mxu1 %vm1021_vm1, %v5389_v48 }
 0x198   : > { %4162 = vmatpush3.bf16.xpose.msra.mxu1 %v1072_v49  ;;  %4163 = vmatprep.mubr.msk.bf16.mxu1 %vm5006_vm0, %v5005_v5 }
 0x199   : > { %4167 = vmatprep.subr.bf16.mxu1 %v5005_v5 }
 0x19f   : > { %4164 = vmatmul.mubr.msk.bf16.vlgmr.msra.gmra.mxu1 %vm1021_vm1, %v5398_v51 }
 0x1a0   : > { %4169 = vmatprep.mubr.msk.bf16.mxu1 %vm5006_vm0, %v5005_v5  ;;  %4168 = vmatpush3.bf16.msra.mxu1 %v1146_v60 }
 0x1a1   : > { %4173 = vmatprep.subr.bf16.mxu1 %v5005_v5 }
 0x257   : > { %v1062_v62 = vpop.f32.mrf.mxu1 }
 0x258   : > { %v1114_v63 = vmul.f32 0.28867513, %v1062_v62 }
 0x259   : > { %v4159_v0 = vpop.f32.mrf.mxu1 }
 0x25a   : > { %v1117_v1 = vsel %vm1116_vm3, %v1114_v63, -inf }
 0x25b   : > { %1118 = vmax.xlane.f32.xlu0 %v1117_v1  ;;  %v1065_v2 = vpop.f32.mrf.mxu1 }
 0x25d   : > { %v4160_v3 = vpop.f32.mrf.mxu1 }
 0x25f   : > { %v1108_v6 = vpop.f32.mrf.mxu1 }
 0x260   : > { %v1115_v7 = vmul.f32 0.28867513, %v1108_v6 }
 0x261   : > { %v4165_v8 = vpop.f32.mrf.mxu1 }
 0x262   : > { %v1120_v9 = vsel %vm1116_vm3, %v1115_v7, -inf }
 0x263   : > { %1121 = vmax.xlane.f32.xlu0 %v1120_v9  ;;  %v1111_v10 = vpop.f32.mrf.mxu1 }
 0x265   : > { %v4166_v11 = vpop.f32.mrf.mxu1 }
 0x279   : > { %1238 = vrot.lane.b32.xlu0 %v5382_v42, %s5007_s0 }
 0x2e4   : > { %v1119_v12 = vpop.xlane.xlu0 %1118 }
 0x2e5   : > { %v1123_v13 = vsub.f32 %v1114_v63, %v1119_v12 }
 0x2e7   : > { %v1125_v14 = vmul.f32 1.442695, %v1123_v13 }
 0x2e9   : > { %4660 = vpow2.f32 %v1125_v14 }
 0x2ec   : > { %v1122_v15 = vpop.xlane.xlu0 %1121 }
 0x2ed   : > { %v1124_v20 = vsub.f32 %v1115_v7, %v1122_v15 }
 0x2ef   : > { %v1127_v21 = vmul.f32 1.442695, %v1124_v20 }
 0x2f0   : > { %v1239_v16 = vpop.permute.xlu0 %1238 }
 0x2f1   : > { %v1244_v17 = vsel %vm1021_vm1, %v1239_v16, 0  ;;  %4662 = vpow2.f32 %v1127_v21 }
 0x2f2   : > { %4180 = vmatpush3.bf16.xpose.msra.mxu0 %v1244_v17 }
 0x2f3   : > { %4191 = vmatprep.subr.bf16.mxu0 %v5005_v5 }
 0x2f6   : > { %v4661_v18 = vpop.eup %4660 }
 0x2f7   : > { %v1129_v19 = vsel %vm1116_vm3, %v4661_v18, 0.0 }
 0x2f8   : > { %1130 = vadd.xlane.f32.xlu1 %v1129_v19 }
 0x2fe   : > { %v4663_v22 = vpop.eup %4662 }
 0x2ff   : > { %v1132_v23 = vsel %vm1116_vm3, %v4663_v22, 0.0 }
 0x309   : > { %1290 = vrot.lane.b32.xlu1 %v5387_v47, %s5007_s0 }
 0x32d   : > { %1133 = vadd.xlane.f32.xlu1 %v1132_v23 }
 0x33e   : > { %1235 = vrot.lane.b32.xlu1 %v5389_v48, %s5007_s0 }
 0x342   : > { %1287 = vrot.lane.b32.xlu1 %v5398_v51, %s5007_s0 }
 0x381   : > { %v1131_v24 = vpop.xlane.xlu1 %1130 }
 0x382   : > { %4664 = vrcp.f32 %v1131_v24 }
 0x385   : > { %v1291_v30 = vpop.permute.xlu1 %1290 }
 0x386   : > { %v1296_v39 = vsel %vm1021_vm1, %v1291_v30, 0 }
 0x38f   : > { %v4665_v25 = vpop.eup %4664 }
 0x390   : > { %v1137_v27 = vmul.f32 %v4665_v25, %v4661_v18 }
 0x392   : > { %v1139_v28 = vpack.c.bf16 %v1137_v27, %v1137_v27 }
 0x394   : > { %4170 = vmatmul.mubr.msk.bf16.vlgmr.msra.gmra.mxu1 %vm1116_vm3, %v1139_v28 }
 0x395   : > { %4174 = vmatpush3.bf16.msra.mxu1 %v1192_v29  ;;  %4175 = vmatprep.mubr.msk.bf16.mxu1 %vm5006_vm0, %v5005_v5 }
 0x396   : > { %4185 = vmatprep.subr.bf16.mxu1 %v5005_v5 }
 0x3b6   : > { %v1134_v31 = vpop.xlane.xlu1 %1133 }
 0x3b7   : > { %4666 = vrcp.f32 %v1134_v31 }
 0x3ba   : > { %v1236_v34 = vpop.permute.xlu1 %1235 }
 0x3bb   : > { %4182 = vmatmul.mubr.msk.bf16.vlgmr.msra.gmra.mxu0 %vm1021_vm1, %v1236_v34 }
 0x3bc   : > { %4193 = vmatprep.mubr.msk.bf16.mxu0 %vm5006_vm0, %v5005_v5 }
 0x3be   : > { %v1288_v40 = vpop.permute.xlu1 %1287 }
 0x3c4   : > { %v4667_v35 = vpop.eup %4666 }
 0x3c5   : > { %v1138_v36 = vmul.f32 %v4667_v35, %v4663_v22 }
 0x3c7   : > { %v1140_v38 = vpack.c.bf16 %v1138_v36, %v1138_v36 }
 0x3c9   : > { %4176 = vmatmul.mubr.msk.bf16.vlgmr.msra.gmra.mxu1 %vm1116_vm3, %v1140_v38 }
 0x3ca   : > { %4186 = vmatpush3.bf16.xpose.msra.mxu1 %v1296_v39  ;;  %4187 = vmatprep.mubr.msk.bf16.mxu1 %vm5006_vm0, %v5005_v5 }
 0x3cb   : > { %4197 = vmatprep.subr.bf16.mxu1 %v5005_v5 }
 0x3d1   : > { %4188 = vmatmul.mubr.msk.bf16.vlgmr.msra.gmra.mxu1 %vm1021_vm1, %v1288_v40 }
 0x3d2   : > { %4199 = vmatprep.mubr.msk.bf16.mxu1 %vm5006_vm0, %v5005_v5 }
 0x454   : > { %v5445_v41 = vpop.f32.mrf.mxu1 }
 0x456   : > { %v4171_v43 = vpop.f32.mrf.mxu1 }
 0x458   : > { %v1185_v44 = vpop.f32.mrf.mxu1 }
 0x45a   : > { %v4172_v45 = vpop.f32.mrf.mxu1 }
 0x47b   : > { %v1280_v46 = vpop.f32.mrf.mxu0 }
 0x47c   : > { %v1338_v49 = vmul.f32 0.28867513, %v1280_v46 }
 0x47d   : > { %v4183_v50 = vpop.f32.mrf.mxu0 }
 0x47e   : > { %v1340_v53 = vsel %vm1116_vm3, %v1338_v49, -inf }
 0x47f   : > { %1341 = vmax.xlane.f32.xlu0 %v1340_v53  ;;  %v1283_v54 = vpop.f32.mrf.mxu0 }
 0x481   : > { %v4184_v55 = vpop.f32.mrf.mxu0 }
 0x489   : > { %v5448_v56 = vpop.f32.mrf.mxu1 }
 0x48b   : > { %v4177_v58 = vpop.f32.mrf.mxu1 }
 0x48d   : > { %v1231_v59 = vpop.f32.mrf.mxu1 }
 0x48f   : > { %v4178_v60 = vpop.f32.mrf.mxu1 }
 0x491   : > { %v1332_v61 = vpop.f32.mrf.mxu1 }
 0x492   : > { %v1339_v62 = vmul.f32 0.28867513, %v1332_v61 }
 0x493   : > { %v4189_v63 = vpop.f32.mrf.mxu1 }
 0x494   : > { %v1343_v0 = vsel %vm1116_vm3, %v1339_v62, -inf }
 0x495   : > { %1344 = vmax.xlane.f32.xlu1 %v1343_v0  ;;  %v1335_v1 = vpop.f32.mrf.mxu1 }
 0x497   : > { %v4190_v2 = vpop.f32.mrf.mxu1 }
 0x4a6   : > { %1414 = vrot.lane.b32.xlu1 %v5426_v26, %s5007_s0 }
 0x4aa   : > { %1464 = vrot.lane.b32.xlu1 %v5382_v42, %s5008_s9 }
 0x4ae   : > { %1514 = vrot.lane.b32.xlu1 %v5387_v47, %s5008_s9 }
 0x4b2   : > { %1512 = vrot.lane.b32.xlu1 %v5398_v51, %s5008_s9 }
 0x508   : > { %v1342_v3 = vpop.xlane.xlu0 %1341 }
 0x509   : > { %v1346_v6 = vsub.f32 %v1338_v49, %v1342_v3 }
 0x50b   : > { %v1348_v7 = vmul.f32 1.442695, %v1346_v6 }
 0x50d   : > { %4668 = vpow2.f32 %v1348_v7 }
 0x51a   : > { %v4669_v8 = vpop.eup %4668 }
 0x51b   : > { %v1352_v9 = vsel %vm1116_vm3, %v4669_v8, 0.0 }
 0x51c   : > { %1353 = vadd.xlane.f32.xlu0 %v1352_v9 }
 0x51e   : > { %v1345_v10 = vpop.xlane.xlu1 %1344 }
 0x51f   : > { %v1347_v11 = vsub.f32 %v1339_v62, %v1345_v10 }
 0x521   : > { %v1350_v12 = vmul.f32 1.442695, %v1347_v11 }
 0x522   : > { %v1415_v13 = vpop.permute.xlu1 %1414 }
 0x523   : > { %4670 = vpow2.f32 %v1350_v12  ;;  %v1420_v14 = vsel %vm1144_vm2, %v1415_v13, 0 }
 0x524   : > { %4198 = vmatpush3.bf16.msra.mxu1 %v1420_v14 }
 0x525   : > { %4209 = vmatprep.subr.bf16.mxu1 %v5005_v5 }
 0x526   : > { %v1465_v23 = vpop.permute.xlu1 %1464 }
 0x527   : > { %v1470_v25 = vsel %vm1021_vm1, %v1465_v23, 0 }
 0x52a   : > { %v1515_v29 = vpop.permute.xlu1 %1514 }
 0x52b   : > { %v1520_v34 = vsel %vm1021_vm1, %v1515_v29, 0 }
 0x52e   : > { %v1513_v35 = vpop.permute.xlu1 %1512 }
 0x530   : > { %v4671_v15 = vpop.eup %4670 }
 0x531   : > { %v1355_v16 = vsel %vm1116_vm3, %v4671_v15, 0.0 }
 0x532   : > { %1356 = vadd.xlane.f32.xlu0 %v1355_v16 }
 0x548   : > { %1365 = vrot.lane.b32.xlu0 %v5407_v57, %s5007_s0 }
 0x54c   : > { %1462 = vrot.lane.b32.xlu0 %v5389_v48, %s5008_s9 }
 0x5a5   : > { %v1354_v17 = vpop.xlane.xlu0 %1353 }
 0x5a6   : > { %4672 = vrcp.f32 %v1354_v17 }
 0x5b3   : > { %v4673_v18 = vpop.eup %4672 }
 0x5b4   : > { %v1360_v20 = vmul.f32 %v4673_v18, %v4669_v8 }
 0x5b6   : > { %v1362_v24 = vpack.c.bf16 %v1360_v20, %v1360_v20 }
 0x5bb   : > { %v1357_v19 = vpop.xlane.xlu0 %1356 }
 0x5bc   : > { %4674 = vrcp.f32 %v1357_v19 }
 0x5bf   : > { %v1366_v21 = vpop.permute.xlu0 %1365 }
 0x5c0   : > { %v1371_v22 = vsel %vm1144_vm2, %v1366_v21, 0 }
 0x5c1   : > { %4192 = vmatpush3.bf16.msra.mxu0 %v1371_v22 }
 0x5c2   : > { %4203 = vmatprep.subr.bf16.mxu0 %v5005_v5 }
 0x5c3   : > { %v1463_v30 = vpop.permute.xlu0 %1462 }
 0x5c4   : > { %4194 = vmatmul.mubr.msk.bf16.vlgmr.msra.gmra.mxu0 %vm1116_vm3, %v1362_v24 }
 0x5c5   : > { %4204 = vmatpush3.bf16.xpose.msra.mxu0 %v1470_v25  ;;  %4205 = vmatprep.mubr.msk.bf16.mxu0 %vm5006_vm0, %v5005_v5 }
 0x5c6   : > { %4215 = vmatprep.subr.bf16.mxu0 %v5005_v5 }
 0x5c9   : > { %v4675_v27 = vpop.eup %4674 }
 0x5ca   : > { %v1361_v28 = vmul.f32 %v4675_v27, %v4671_v15 }
 0x5cc   : > { %4206 = vmatmul.mubr.msk.bf16.vlgmr.msra.gmra.mxu0 %vm1021_vm1, %v1463_v30  ;;  %v1363_v31 = vpack.c.bf16 %v1361_v28, %v1361_v28 }
 0x5cd   : > { %4217 = vmatprep.mubr.msk.bf16.mxu0 %vm5006_vm0, %v5005_v5 }
 0x5ce   : > { %4200 = vmatmul.mubr.msk.bf16.vlgmr.msra.gmra.mxu1 %vm1116_vm3, %v1363_v31 }
 0x5cf   : > { %4210 = vmatpush3.bf16.xpose.msra.mxu1 %v1520_v34  ;;  %4211 = vmatprep.mubr.msk.bf16.mxu1 %vm5006_vm0, %v5005_v5 }
 0x5d0   : > { %4221 = vmatprep.subr.bf16.mxu1 %v5005_v5 }
 0x5d6   : > { %4212 = vmatmul.mubr.msk.bf16.vlgmr.msra.gmra.mxu1 %vm1021_vm1, %v1513_v35 }
 0x5d7   : > { %4223 = vmatprep.mubr.msk.bf16.mxu1 %vm5006_vm0, %v5005_v5 }
 0x684   : > { %v5485_v36 = vpop.f32.mrf.mxu0 }
 0x686   : > { %v4195_v38 = vpop.f32.mrf.mxu0 }
 0x688   : > { %v1410_v39 = vpop.f32.mrf.mxu0 }
 0x68a   : > { %v4196_v40 = vpop.f32.mrf.mxu0 }
 0x68c   : > { %v1506_v43 = vpop.f32.mrf.mxu0 }
 0x68d   : > { %v1562_v44 = vmul.f32 0.28867513, %v1506_v43 }
 0x68e   : > { %v5487_v45 = vpop.f32.mrf.mxu1  ;;  %v4207_v46 = vpop.f32.mrf.mxu0 }
 0x68f   : > { %v4529_v49 = vpack.i.bf16 %v5487_v45, %v5485_v36  ;;  %v1564_v50 = vsel %vm1116_vm3, %v1562_v44, -inf }
 0x690   : > { %1565 = vmax.xlane.f32.xlu0 %v1564_v50  ;;  %v4201_v53 = vpop.f32.mrf.mxu1  ;;  %v1509_v54 = vpop.f32.mrf.mxu0 }
 0x692   : > { %v1459_v55 = vpop.f32.mrf.mxu1  ;;  %v4208_v58 = vpop.f32.mrf.mxu0 }
 0x694   : > { %v4202_v59 = vpop.f32.mrf.mxu1 }
 0x696   : > { %v1556_v60 = vpop.f32.mrf.mxu1 }
 0x697   : > { %v1563_v61 = vmul.f32 0.28867513, %v1556_v60 }
 0x698   : > { %v4213_v62 = vpop.f32.mrf.mxu1 }
 0x699   : > { %v1567_v63 = vsel %vm1116_vm3, %v1563_v61, -inf }
 0x69a   : > { %1568 = vmax.xlane.f32.xlu1 %v1567_v63  ;;  %v1559_v0 = vpop.f32.mrf.mxu1 }
 0x69c   : > { %v4214_v1 = vpop.f32.mrf.mxu1 }
 0x6ab   : > { %1636 = vrot.lane.b32.xlu1 %v5426_v26, %s5008_s9 }
 0x6af   : > { %1686 = vrot.lane.b32.xlu1 %v5382_v42, %s5009_s29 }
 0x6b3   : > { %1736 = vrot.lane.b32.xlu1 %v5387_v47, %s5009_s29 }
 0x6b7   : > { %1734 = vrot.lane.b32.xlu1 %v5398_v51, %s5009_s29 }
 0x719   : > { %v1566_v2 = vpop.xlane.xlu0 %1565 }
 0x71a   : > { %v1570_v3 = vsub.f32 %v1562_v44, %v1566_v2 }
 0x71c   : > { %v1572_v6 = vmul.f32 1.442695, %v1570_v3 }
 0x71e   : > { %4676 = vpow2.f32 %v1572_v6 }
 0x723   : > { %v1569_v7 = vpop.xlane.xlu1 %1568 }
 0x724   : > { %v1571_v8 = vsub.f32 %v1563_v61, %v1569_v7 }
 0x726   : > { %v1574_v9 = vmul.f32 1.442695, %v1571_v8 }
 0x727   : > { %v1637_v10 = vpop.permute.xlu1 %1636 }
 0x728   : > { %4678 = vpow2.f32 %v1574_v9  ;;  %v1642_v11 = vsel %vm1144_vm2, %v1637_v10, 0 }
 0x729   : > { %4222 = vmatpush3.bf16.msra.mxu1 %v1642_v11 }
 0x72a   : > { %4233 = vmatprep.subr.bf16.mxu1 %v5005_v5 }
 0x72b   : > { %v4677_v12 = vpop.eup %4676  ;;  %v1687_v22 = vpop.permute.xlu1 %1686 }
 0x72c   : > { %v1576_v13 = vsel %vm1116_vm3, %v4677_v12, 0.0  ;;  %v1692_v24 = vsel %vm1021_vm1, %v1687_v22, 0 }
 0x72d   : > { %1577 = vadd.xlane.f32.xlu0 %v1576_v13 }
 0x72f   : > { %v1737_v28 = vpop.permute.xlu1 %1736 }
 0x730   : > { %v1742_v31 = vsel %vm1021_vm1, %v1737_v28, 0 }
 0x733   : > { %v1735_v34 = vpop.permute.xlu1 %1734 }
 0x735   : > { %v4679_v14 = vpop.eup %4678 }
 0x736   : > { %v1579_v15 = vsel %vm1116_vm3, %v4679_v14, 0.0 }
 0x737   : > { %1580 = vadd.xlane.f32.xlu0 %v1579_v15 }
 0x74d   : > { %1588 = vrot.lane.b32.xlu0 %v5407_v57, %s5008_s9 }
 0x751   : > { %1684 = vrot.lane.b32.xlu0 %v5389_v48, %s5009_s29 }
 0x7b6   : > { %v1578_v16 = vpop.xlane.xlu0 %1577 }
 0x7b7   : > { %4680 = vrcp.f32 %v1578_v16 }
 0x7c0   : > { %v1581_v17 = vpop.xlane.xlu0 %1580 }
 0x7c1   : > { %4682 = vrcp.f32 %v1581_v17 }
 0x7c4   : > { %v4681_v18 = vpop.eup %4680  ;;  %v1589_v19 = vpop.permute.xlu0 %1588 }
 0x7c5   : > { %v1594_v20 = vsel %vm1144_vm2, %v1589_v19, 0  ;;  %v1584_v21 = vmul.f32 %v4681_v18, %v4677_v12 }
 0x7c6   : > { %4216 = vmatpush3.bf16.msra.mxu0 %v1594_v20 }
 0x7c7   : > { %v1586_v23 = vpack.c.bf16 %v1584_v21, %v1584_v21  ;;  %4227 = vmatprep.subr.bf16.mxu0 %v5005_v5 }
 0x7c8   : > { %v1685_v29 = vpop.permute.xlu0 %1684 }
 0x7c9   : > { %4218 = vmatmul.mubr.msk.bf16.vlgmr.msra.gmra.mxu0 %vm1116_vm3, %v1586_v23 }
 0x7ca   : > { %4228 = vmatpush3.bf16.xpose.msra.mxu0 %v1692_v24  ;;  %4229 = vmatprep.mubr.msk.bf16.mxu0 %vm5006_vm0, %v5005_v5 }
 0x7cb   : > { %4239 = vmatprep.subr.bf16.mxu0 %v5005_v5 }
 0x7ce   : > { %v4683_v25 = vpop.eup %4682 }
 0x7cf   : > { %v1585_v27 = vmul.f32 %v4683_v25, %v4679_v14 }
 0x7d1   : > { %4230 = vmatmul.mubr.msk.bf16.vlgmr.msra.gmra.mxu0 %vm1021_vm1, %v1685_v29  ;;  %v1587_v30 = vpack.c.bf16 %v1585_v27, %v1585_v27 }
 0x7d2   : > { %4241 = vmatprep.mubr.msk.bf16.mxu0 %vm5006_vm0, %v5005_v5 }
 0x7d3   : > { %4224 = vmatmul.mubr.msk.bf16.vlgmr.msra.gmra.mxu1 %vm1116_vm3, %v1587_v30 }
 0x7d4   : > { %4234 = vmatpush3.bf16.xpose.msra.mxu1 %v1742_v31  ;;  %4235 = vmatprep.mubr.msk.bf16.mxu1 %vm5006_vm0, %v5005_v5 }
 0x7d5   : > { %4245 = vmatprep.subr.bf16.mxu1 %v5005_v5 }
 0x7db   : > { %4236 = vmatmul.mubr.msk.bf16.vlgmr.msra.gmra.mxu1 %vm1021_vm1, %v1735_v34 }
 0x7dc   : > { %4247 = vmatprep.mubr.msk.bf16.mxu1 %vm5006_vm0, %v5005_v5 }
 0x889   : > { %v5527_v35 = vpop.f32.mrf.mxu0 }
 0x88b   : > { %v4219_v38 = vpop.f32.mrf.mxu0 }
 0x88d   : > { %v1633_v39 = vpop.f32.mrf.mxu0 }
 0x88f   : > { %v4220_v40 = vpop.f32.mrf.mxu0 }
 0x891   : > { %v1728_v43 = vpop.f32.mrf.mxu0 }
 0x892   : > { %v1784_v44 = vmul.f32 0.28867513, %v1728_v43 }
 0x893   : > { %v5529_v46 = vpop.f32.mrf.mxu1  ;;  %v4231_v50 = vpop.f32.mrf.mxu0 }
 0x894   : > { %v4534_v53 = vpack.i.bf16 %v5529_v46, %v5527_v35  ;;  %v1786_v54 = vsel %vm1116_vm3, %v1784_v44, -inf }
 0x895   : > { %1787 = vmax.xlane.f32.xlu0 %v1786_v54  ;;  %v4225_v55 = vpop.f32.mrf.mxu1  ;;  %v1731_v58 = vpop.f32.mrf.mxu0 }
 0x897   : > { %v1681_v59 = vpop.f32.mrf.mxu1  ;;  %v4232_v60 = vpop.f32.mrf.mxu0 }
 0x899   : > { %v4226_v61 = vpop.f32.mrf.mxu1 }
 0x89b   : > { %v1778_v62 = vpop.f32.mrf.mxu1 }
 0x89c   : > { %v1785_v63 = vmul.f32 0.28867513, %v1778_v62 }
 0x89d   : > { %v4237_v0 = vpop.f32.mrf.mxu1 }
 0x89e   : > { %v1789_v1 = vsel %vm1116_vm3, %v1785_v63, -inf }
 0x89f   : > { %1790 = vmax.xlane.f32.xlu1 %v1789_v1  ;;  %v1781_v2 = vpop.f32.mrf.mxu1 }
 0x8a1   : > { %v4238_v3 = vpop.f32.mrf.mxu1 }
 0x8b0   : > { %1858 = vrot.lane.b32.xlu1 %v5426_v26, %s5009_s29 }
 0x8b4   : > { %1908 = vrot.lane.b32.xlu1 %v5382_v42, %s5010_s16 }
 0x8b8   : > { %1958 = vrot.lane.b32.xlu1 %v5387_v47, %s5010_s16 }
 0x8bc   : > { %1956 = vrot.lane.b32.xlu1 %v5398_v51, %s5010_s16 }
 0x91e   : > { %v1788_v6 = vpop.xlane.xlu0 %1787 }
 0x91f   : > { %v1792_v7 = vsub.f32 %v1784_v44, %v1788_v6 }
 0x921   : > { %v1794_v8 = vmul.f32 1.442695, %v1792_v7 }
 0x923   : > { %4684 = vpow2.f32 %v1794_v8 }
 0x928   : > { %v1791_v9 = vpop.xlane.xlu1 %1790 }
 0x929   : > { %v1793_v10 = vsub.f32 %v1785_v63, %v1791_v9 }
 0x92b   : > { %v1796_v11 = vmul.f32 1.442695, %v1793_v10 }
 0x92c   : > { %v1859_v12 = vpop.permute.xlu1 %1858 }
 0x92d   : > { %4686 = vpow2.f32 %v1796_v11  ;;  %v1864_v13 = vsel %vm1144_vm2, %v1859_v12, 0 }
 0x92e   : > { %4246 = vmatpush3.bf16.msra.mxu1 %v1864_v13 }
 0x92f   : > { %4257 = vmatprep.subr.bf16.mxu1 %v5005_v5 }
 0x930   : > { %v4685_v14 = vpop.eup %4684  ;;  %v1909_v24 = vpop.permute.xlu1 %1908 }
 0x931   : > { %v1798_v15 = vsel %vm1116_vm3, %v4685_v14, 0.0  ;;  %v1914_v27 = vsel %vm1021_vm1, %v1909_v24, 0 }
 0x932   : > { %1799 = vadd.xlane.f32.xlu0 %v1798_v15 }
 0x934   : > { %v1959_v30 = vpop.permute.xlu1 %1958 }
 0x935   : > { %v1964_v38 = vsel %vm1021_vm1, %v1959_v30, 0 }
 0x938   : > { %v1957_v39 = vpop.permute.xlu1 %1956 }
 0x93a   : > { %v4687_v16 = vpop.eup %4686 }
 0x93b   : > { %v1801_v17 = vsel %vm1116_vm3, %v4687_v16, 0.0 }
 0x93c   : > { %1802 = vadd.xlane.f32.xlu0 %v1801_v17 }
 0x952   : > { %1810 = vrot.lane.b32.xlu0 %v5407_v57, %s5009_s29 }
 0x956   : > { %1906 = vrot.lane.b32.xlu0 %v5389_v48, %s5010_s16 }
 0x9bb   : > { %v1800_v18 = vpop.xlane.xlu0 %1799 }
 0x9bc   : > { %4688 = vrcp.f32 %v1800_v18 }
 0x9c5   : > { %v1803_v19 = vpop.xlane.xlu0 %1802 }
 0x9c6   : > { %4690 = vrcp.f32 %v1803_v19 }
 0x9c9   : > { %v4689_v20 = vpop.eup %4688  ;;  %v1811_v21 = vpop.permute.xlu0 %1810 }
 0x9ca   : > { %v1816_v22 = vsel %vm1144_vm2, %v1811_v21, 0  ;;  %v1806_v23 = vmul.f32 %v4689_v20, %v4685_v14 }
 0x9cb   : > { %4240 = vmatpush3.bf16.msra.mxu0 %v1816_v22 }
 0x9cc   : > { %v1808_v25 = vpack.c.bf16 %v1806_v23, %v1806_v23  ;;  %4251 = vmatprep.subr.bf16.mxu0 %v5005_v5 }
 0x9cd   : > { %v1907_v31 = vpop.permute.xlu0 %1906 }
 0x9ce   : > { %4242 = vmatmul.mubr.msk.bf16.vlgmr.msra.gmra.mxu0 %vm1116_vm3, %v1808_v25 }
 0x9cf   : > { %4252 = vmatpush3.bf16.xpose.msra.mxu0 %v1914_v27  ;;  %4253 = vmatprep.mubr.msk.bf16.mxu0 %vm5006_vm0, %v5005_v5 }
 0x9d0   : > { %4263 = vmatprep.subr.bf16.mxu0 %v5005_v5 }
 0x9d3   : > { %v4691_v28 = vpop.eup %4690 }
 0x9d4   : > { %v1807_v29 = vmul.f32 %v4691_v28, %v4687_v16 }
 0x9d6   : > { %4254 = vmatmul.mubr.msk.bf16.vlgmr.msra.gmra.mxu0 %vm1021_vm1, %v1907_v31  ;;  %v1809_v34 = vpack.c.bf16 %v1807_v29, %v1807_v29 }
 0x9d7   : > { %4265 = vmatprep.mubr.msk.bf16.mxu0 %vm5006_vm0, %v5005_v5 }
 0x9d8   : > { %4248 = vmatmul.mubr.msk.bf16.vlgmr.msra.gmra.mxu1 %vm1116_vm3, %v1809_v34 }
 0x9d9   : > { %4258 = vmatpush3.bf16.xpose.msra.mxu1 %v1964_v38  ;;  %4259 = vmatprep.mubr.msk.bf16.mxu1 %vm5006_vm0, %v5005_v5 }
 0x9da   : > { %4269 = vmatprep.subr.bf16.mxu1 %v5005_v5 }
 0x9e0   : > { %4260 = vmatmul.mubr.msk.bf16.vlgmr.msra.gmra.mxu1 %vm1021_vm1, %v1957_v39 }
 0x9e1   : > { %4271 = vmatprep.mubr.msk.bf16.mxu1 %vm5006_vm0, %v5005_v5 }
 0xa8e   : > { %v5569_v40 = vpop.f32.mrf.mxu0 }
 0xa90   : > { %v4243_v43 = vpop.f32.mrf.mxu0 }
 0xa92   : > { %v1855_v44 = vpop.f32.mrf.mxu0 }
 0xa94   : > { %v4244_v50 = vpop.f32.mrf.mxu0 }
 0xa96   : > { %v1950_v54 = vpop.f32.mrf.mxu0 }
 0xa97   : > { %v2006_v55 = vmul.f32 0.28867513, %v1950_v54 }
 0xa98   : > { %v5571_v58 = vpop.f32.mrf.mxu1  ;;  %v4255_v59 = vpop.f32.mrf.mxu0 }
 0xa99   : > { %v4539_v60 = vpack.i.bf16 %v5571_v58, %v5569_v40  ;;  %v2008_v61 = vsel %vm1116_vm3, %v2006_v55, -inf }
 0xa9a   : > { %2009 = vmax.xlane.f32.xlu0 %v2008_v61  ;;  %v4249_v62 = vpop.f32.mrf.mxu1  ;;  %v1953_v63 = vpop.f32.mrf.mxu0 }
 0xa9c   : > { %v1903_v0 = vpop.f32.mrf.mxu1  ;;  %v4256_v1 = vpop.f32.mrf.mxu0 }
 0xa9e   : > { %v4250_v2 = vpop.f32.mrf.mxu1 }
 0xaa0   : > { %v2000_v3 = vpop.f32.mrf.mxu1 }
 0xaa1   : > { %v2007_v6 = vmul.f32 0.28867513, %v2000_v3 }
 0xaa2   : > { %v4261_v7 = vpop.f32.mrf.mxu1 }
 0xaa3   : > { %v2011_v8 = vsel %vm1116_vm3, %v2007_v6, -inf }
 0xaa4   : > { %2012 = vmax.xlane.f32.xlu1 %v2011_v8  ;;  %v2003_v9 = vpop.f32.mrf.mxu1 }
 0xaa6   : > { %v4262_v10 = vpop.f32.mrf.mxu1 }
 0xab5   : > { %2080 = vrot.lane.b32.xlu1 %v5426_v26, %s5010_s16 }
 0xab9   : > { %2130 = vrot.lane.b32.xlu1 %v5382_v42, %s5011_s22 }
 0xabd   : > { %2180 = vrot.lane.b32.xlu1 %v5387_v47, %s5011_s22 }
 0xac1   : > { %2178 = vrot.lane.b32.xlu1 %v5398_v51, %s5011_s22 }
 0xb23   : > { %v2010_v11 = vpop.xlane.xlu0 %2009 }
 0xb24   : > { %v2014_v12 = vsub.f32 %v2006_v55, %v2010_v11 }
 0xb26   : > { %v2016_v13 = vmul.f32 1.442695, %v2014_v12 }
 0xb28   : > { %4692 = vpow2.f32 %v2016_v13 }
 0xb2d   : > { %v2013_v14 = vpop.xlane.xlu1 %2012 }
 0xb2e   : > { %v2015_v15 = vsub.f32 %v2007_v6, %v2013_v14 }
 0xb30   : > { %v2018_v16 = vmul.f32 1.442695, %v2015_v15 }
 0xb31   : > { %v2081_v17 = vpop.permute.xlu1 %2080 }
 0xb32   : > { %4694 = vpow2.f32 %v2018_v16  ;;  %v2086_v18 = vsel %vm1144_vm2, %v2081_v17, 0 }
 0xb33   : > { %4270 = vmatpush3.bf16.msra.mxu1 %v2086_v18 }
 0xb34   : > { %4281 = vmatprep.subr.bf16.mxu1 %v5005_v5 }
 0xb35   : > { %v4693_v19 = vpop.eup %4692  ;;  %v2131_v30 = vpop.permute.xlu1 %2130 }
 0xb36   : > { %v2020_v20 = vsel %vm1116_vm3, %v4693_v19, 0.0  ;;  %v2136_v34 = vsel %vm1021_vm1, %v2131_v30, 0 }
 0xb37   : > { %2021 = vadd.xlane.f32.xlu0 %v2020_v20 }
 0xb39   : > { %v2181_v43 = vpop.permute.xlu1 %2180 }
 0xb3a   : > { %v2186_v54 = vsel %vm1021_vm1, %v2181_v43, 0 }
 0xb3d   : > { %v2179_v55 = vpop.permute.xlu1 %2178 }
 0xb3f   : > { %v4695_v21 = vpop.eup %4694 }
 0xb40   : > { %v2023_v22 = vsel %vm1116_vm3, %v4695_v21, 0.0 }
 0xb41   : > { %2024 = vadd.xlane.f32.xlu0 %v2023_v22 }
 0xb57   : > { %2032 = vrot.lane.b32.xlu0 %v5407_v57, %s5010_s16 }
 0xb5b   : > { %2128 = vrot.lane.b32.xlu0 %v5389_v48, %s5011_s22 }
 0xbc0   : > { %v2022_v23 = vpop.xlane.xlu0 %2021 }
 0xbc1   : > { %4696 = vrcp.f32 %v2022_v23 }
 0xbca   : > { %v2025_v24 = vpop.xlane.xlu0 %2024 }
 0xbcb   : > { %4698 = vrcp.f32 %v2025_v24 }
 0xbce   : > { %v4697_v25 = vpop.eup %4696  ;;  %v2033_v27 = vpop.permute.xlu0 %2032 }
 0xbcf   : > { %v2038_v28 = vsel %vm1144_vm2, %v2033_v27, 0  ;;  %v2028_v29 = vmul.f32 %v4697_v25, %v4693_v19 }
 0xbd0   : > { %4264 = vmatpush3.bf16.msra.mxu0 %v2038_v28 }
 0xbd1   : > { %v2030_v31 = vpack.c.bf16 %v2028_v29, %v2028_v29  ;;  %4275 = vmatprep.subr.bf16.mxu0 %v5005_v5 }
 0xbd2   : > { %v2129_v44 = vpop.permute.xlu0 %2128 }
 0xbd3   : > { %4266 = vmatmul.mubr.msk.bf16.vlgmr.msra.gmra.mxu0 %vm1116_vm3, %v2030_v31 }
 0xbd4   : > { %4276 = vmatpush3.bf16.xpose.msra.mxu0 %v2136_v34  ;;  %4277 = vmatprep.mubr.msk.bf16.mxu0 %vm5006_vm0, %v5005_v5 }
 0xbd5   : > { %4287 = vmatprep.subr.bf16.mxu0 %v5005_v5 }
 0xbd8   : > { %v4699_v38 = vpop.eup %4698 }
 0xbd9   : > { %v2029_v39 = vmul.f32 %v4699_v38, %v4695_v21 }
 0xbdb   : > { %4278 = vmatmul.mubr.msk.bf16.vlgmr.msra.gmra.mxu0 %vm1021_vm1, %v2129_v44  ;;  %v2031_v50 = vpack.c.bf16 %v2029_v39, %v2029_v39 }
 0xbdc   : > { %4289 = vmatprep.mubr.msk.bf16.mxu0 %vm5006_vm0, %v5005_v5 }
 0xbdd   : > { %4272 = vmatmul.mubr.msk.bf16.vlgmr.msra.gmra.mxu1 %vm1116_vm3, %v2031_v50 }
 0xbde   : > { %4282 = vmatpush3.bf16.xpose.msra.mxu1 %v2186_v54  ;;  %4283 = vmatprep.mubr.msk.bf16.mxu1 %vm5006_vm0, %v5005_v5 }
 0xbdf   : > { %4293 = vmatprep.subr.bf16.mxu1 %v5005_v5 }
 0xbe5   : > { %4284 = vmatmul.mubr.msk.bf16.vlgmr.msra.gmra.mxu1 %vm1021_vm1, %v2179_v55 }
 0xbe6   : > { %4295 = vmatprep.mubr.msk.bf16.mxu1 %vm5006_vm0, %v5005_v5 }
 0xc93   : > { %v5611_v59 = vpop.f32.mrf.mxu0 }
 0xc95   : > { %v4267_v61 = vpop.f32.mrf.mxu0 }
 0xc97   : > { %v2077_v62 = vpop.f32.mrf.mxu0 }
 0xc99   : > { %v4268_v63 = vpop.f32.mrf.mxu0 }
 0xc9b   : > { %v2172_v0 = vpop.f32.mrf.mxu0 }
 0xc9c   : > { %v2228_v1 = vmul.f32 0.28867513, %v2172_v0 }
 0xc9d   : > { %v5613_v2 = vpop.f32.mrf.mxu1  ;;  %v4279_v3 = vpop.f32.mrf.mxu0 }
 0xc9e   : > { %v4544_v6 = vpack.i.bf16 %v5613_v2, %v5611_v59  ;;  %v2230_v7 = vsel %vm1116_vm3, %v2228_v1, -inf }
 0xc9f   : > { %2231 = vmax.xlane.f32.xlu0 %v2230_v7  ;;  %v4273_v8 = vpop.f32.mrf.mxu1  ;;  %v2175_v9 = vpop.f32.mrf.mxu0 }
 0xca1   : > { %v2125_v10 = vpop.f32.mrf.mxu1  ;;  %v4280_v11 = vpop.f32.mrf.mxu0 }
 0xca3   : > { %v4274_v12 = vpop.f32.mrf.mxu1 }
 0xca5   : > { %v2222_v13 = vpop.f32.mrf.mxu1 }
 0xca6   : > { %v2229_v14 = vmul.f32 0.28867513, %v2222_v13 }
 0xca7   : > { %v4285_v15 = vpop.f32.mrf.mxu1 }
 0xca8   : > { %v2233_v16 = vsel %vm1116_vm3, %v2229_v14, -inf }
 0xca9   : > { %2234 = vmax.xlane.f32.xlu1 %v2233_v16  ;;  %v2225_v17 = vpop.f32.mrf.mxu1 }
 0xcab   : > { %v4286_v18 = vpop.f32.mrf.mxu1 }
 0xcba   : > { %2302 = vrot.lane.b32.xlu1 %v5426_v26, %s5011_s22 }
 0xcbe   : > { %2352 = vrot.lane.b32.xlu1 %v5382_v42, %s5012_s20 }
 0xcc2   : > { %2402 = vrot.lane.b32.xlu1 %v5387_v47, %s5012_s20 }
 0xcc6   : > { %2400 = vrot.lane.b32.xlu1 %v5398_v51, %s5012_s20 }
 0xd28   : > { %v2232_v19 = vpop.xlane.xlu0 %2231 }
 0xd29   : > { %v2236_v20 = vsub.f32 %v2228_v1, %v2232_v19 }
 0xd2b   : > { %v2238_v21 = vmul.f32 1.442695, %v2236_v20 }
 0xd2d   : > { %4700 = vpow2.f32 %v2238_v21 }
 0xd32   : > { %v2235_v22 = vpop.xlane.xlu1 %2234 }
 0xd33   : > { %v2237_v23 = vsub.f32 %v2229_v14, %v2235_v22 }
 0xd35   : > { %v2240_v24 = vmul.f32 1.442695, %v2237_v23 }
 0xd36   : > { %v2303_v25 = vpop.permute.xlu1 %2302 }
 0xd37   : > { %4702 = vpow2.f32 %v2240_v24  ;;  %v2308_v27 = vsel %vm1144_vm2, %v2303_v25, 0 }
 0xd38   : > { %4294 = vmatpush3.bf16.msra.mxu1 %v2308_v27 }
 0xd39   : > { %4305 = vmatprep.subr.bf16.mxu1 %v5005_v5 }
 0xd3a   : > { %v4701_v28 = vpop.eup %4700  ;;  %v2353_v54 = vpop.permute.xlu1 %2352 }
 0xd3b   : > { %v2242_v29 = vsel %vm1116_vm3, %v4701_v28, 0.0  ;;  %v2358_v61 = vsel %vm1021_vm1, %v2353_v54, 0 }
 0xd3c   : > { %2243 = vadd.xlane.f32.xlu0 %v2242_v29 }
 0xd3e   : > { %v2403_v0 = vpop.permute.xlu1 %2402 }
 0xd3f   : > { %v2408_v7 = vsel %vm1021_vm1, %v2403_v0, 0 }
 0xd42   : > { %v2401_v8 = vpop.permute.xlu1 %2400 }
 0xd44   : > { %v4703_v30 = vpop.eup %4702 }
 0xd45   : > { %v2245_v31 = vsel %vm1116_vm3, %v4703_v30, 0.0 }
 0xd46   : > { %2246 = vadd.xlane.f32.xlu0 %v2245_v31 }
 0xd5c   : > { %2254 = vrot.lane.b32.xlu0 %v5407_v57, %s5011_s22 }
 0xd60   : > { %2350 = vrot.lane.b32.xlu0 %v5389_v48, %s5012_s20 }
 0xdc5   : > { %v2244_v34 = vpop.xlane.xlu0 %2243 }
 0xdc6   : > { %4704 = vrcp.f32 %v2244_v34 }
 0xdcf   : > { %v2247_v38 = vpop.xlane.xlu0 %2246 }
 0xdd0   : > { %4706 = vrcp.f32 %v2247_v38 }
 0xdd3   : > { %v4705_v39 = vpop.eup %4704  ;;  %v2255_v43 = vpop.permute.xlu0 %2254 }
 0xdd4   : > { %v2260_v44 = vsel %vm1144_vm2, %v2255_v43, 0  ;;  %v2250_v50 = vmul.f32 %v4705_v39, %v4701_v28 }
 0xdd5   : > { %4288 = vmatpush3.bf16.msra.mxu0 %v2260_v44 }
 0xdd6   : > { %v2252_v55 = vpack.c.bf16 %v2250_v50, %v2250_v50  ;;  %4299 = vmatprep.subr.bf16.mxu0 %v5005_v5 }
 0xdd7   : > { %v2351_v1 = vpop.permute.xlu0 %2350 }
 0xdd8   : > { %4290 = vmatmul.mubr.msk.bf16.vlgmr.msra.gmra.mxu0 %vm1116_vm3, %v2252_v55 }
 0xdd9   : > { %4300 = vmatpush3.bf16.xpose.msra.mxu0 %v2358_v61  ;;  %4301 = vmatprep.mubr.msk.bf16.mxu0 %vm5006_vm0, %v5005_v5 }
 0xdda   : > { %4311 = vmatprep.subr.bf16.mxu0 %v5005_v5 }
 0xddd   : > { %v4707_v62 = vpop.eup %4706 }
 0xdde   : > { %v2251_v63 = vmul.f32 %v4707_v62, %v4703_v30 }
 0xde0   : > { %4302 = vmatmul.mubr.msk.bf16.vlgmr.msra.gmra.mxu0 %vm1021_vm1, %v2351_v1  ;;  %v2253_v3 = vpack.c.bf16 %v2251_v63, %v2251_v63 }
 0xde1   : > { %4313 = vmatprep.mubr.msk.bf16.mxu0 %vm5006_vm0, %v5005_v5 }
 0xde2   : > { %4296 = vmatmul.mubr.msk.bf16.vlgmr.msra.gmra.mxu1 %vm1116_vm3, %v2253_v3 }
 0xde3   : > { %4306 = vmatpush3.bf16.xpose.msra.mxu1 %v2408_v7  ;;  %4307 = vmatprep.mubr.msk.bf16.mxu1 %vm5006_vm0, %v5005_v5 }
 0xde4   : > { %4317 = vmatprep.subr.bf16.mxu1 %v5005_v5 }
 0xdea   : > { %4308 = vmatmul.mubr.msk.bf16.vlgmr.msra.gmra.mxu1 %vm1021_vm1, %v2401_v8 }
 0xdeb   : > { %4319 = vmatprep.mubr.msk.bf16.mxu1 %vm5006_vm0, %v5005_v5 }
 0xe98   : > { %v5653_v9 = vpop.f32.mrf.mxu0 }
 0xe9a   : > { %v4291_v10 = vpop.f32.mrf.mxu0 }
 0xe9c   : > { %v2299_v11 = vpop.f32.mrf.mxu0 }
 0xe9e   : > { %v4292_v12 = vpop.f32.mrf.mxu0 }
 0xea0   : > { %v2394_v13 = vpop.f32.mrf.mxu0 }
 0xea1   : > { %v2450_v14 = vmul.f32 0.28867513, %v2394_v13 }
 0xea2   : > { %v5655_v15 = vpop.f32.mrf.mxu1  ;;  %v4303_v16 = vpop.f32.mrf.mxu0 }
 0xea3   : > { %v4549_v17 = vpack.i.bf16 %v5655_v15, %v5653_v9  ;;  %v2452_v18 = vsel %vm1116_vm3, %v2450_v14, -inf  ;;  %v4596_v15 = vld [vmem:[%s5283_s8 + $0x38] sm:$0xff]  }
 0xea4   : > { %2453 = vmax.xlane.f32.xlu0 %v2452_v18  ;;  %v4297_v19 = vpop.f32.mrf.mxu1  ;;  %v2397_v20 = vpop.f32.mrf.mxu0 }
 0xea6   : > { %v2347_v21 = vpop.f32.mrf.mxu1  ;;  %v4304_v22 = vpop.f32.mrf.mxu0 }
 0xea8   : > { %v4298_v23 = vpop.f32.mrf.mxu1 }
 0xeaa   : > { %v2444_v24 = vpop.f32.mrf.mxu1 }
 0xeab   : > { %v2451_v25 = vmul.f32 0.28867513, %v2444_v24 }
 0xeac   : > { %v4309_v27 = vpop.f32.mrf.mxu1 }
 0xead   : > { %v2455_v28 = vsel %vm1116_vm3, %v2451_v25, -inf }
 0xeae   : > { %2456 = vmax.xlane.f32.xlu1 %v2455_v28  ;;  %v2447_v29 = vpop.f32.mrf.mxu1 }
 0xeb0   : > { %v4310_v30 = vpop.f32.mrf.mxu1 }
 0xebf   : > { %2524 = vrot.lane.b32.xlu1 %v5426_v26, %s5012_s20 }
 0xec3   : > { %2574 = vrot.lane.b32.xlu1 %v5382_v42, %s5013_s19 }
 0xec7   : > { %2624 = vrot.lane.b32.xlu1 %v5387_v47, %s5013_s19 }
 0xecb   : > { %2622 = vrot.lane.b32.xlu1 %v5398_v51, %s5013_s19 }
 0xf2d   : > { %v2454_v31 = vpop.xlane.xlu0 %2453 }
 0xf2e   : > { %v2458_v34 = vsub.f32 %v2450_v14, %v2454_v31 }
 0xf30   : > { %v2460_v38 = vmul.f32 1.442695, %v2458_v34 }
 0xf32   : > { %4708 = vpow2.f32 %v2460_v38 }
 0xf37   : > { %v2457_v39 = vpop.xlane.xlu1 %2456 }
 0xf38   : > { %v2459_v43 = vsub.f32 %v2451_v25, %v2457_v39 }
 0xf3a   : > { %v2462_v44 = vmul.f32 1.442695, %v2459_v43 }
 0xf3b   : > { %v2525_v50 = vpop.permute.xlu1 %2524 }
 0xf3c   : > { %4710 = vpow2.f32 %v2462_v44  ;;  %v2530_v54 = vsel %vm1144_vm2, %v2525_v50, 0 }
 0xf3d   : > { %4318 = vmatpush3.bf16.msra.mxu1 %v2530_v54 }
 0xf3e   : > { %4329 = vmatprep.subr.bf16.mxu1 %v5005_v5 }
 0xf3f   : > { %v4709_v42 = vpop.eup %4708  ;;  %v2575_v7 = vpop.permute.xlu1 %2574 }
 0xf40   : > { %v2464_v47 = vsel %vm1116_vm3, %v4709_v42, 0.0  ;;  %v2580_v10 = vsel %vm1021_vm1, %v2575_v7, 0  ;;  %v4599_v7 = vld [vmem:[%s5283_s8 + $0x20] sm:$0xff]  }
 0xf41   : > { %2465 = vadd.xlane.f32.xlu0 %v2464_v47 }
 0xf43   : > { %v2625_v12 = vpop.permute.xlu1 %2624 }
 0xf44   : > { %v2630_v16 = vsel %vm1021_vm1, %v2625_v12, 0 }
 0xf47   : > { %v2623_v18 = vpop.permute.xlu1 %2622 }
 0xf49   : > { %v4711_v55 = vpop.eup %4710 }
 0xf4a   : > { %v2467_v51 = vsel %vm1116_vm3, %v4711_v55, 0.0 }
 0xf4b   : > { %2468 = vadd.xlane.f32.xlu0 %v2467_v51 }
 0xf61   : > { %2476 = vrot.lane.b32.xlu0 %v5407_v57, %s5012_s20 }
 0xf65   : > { %2572 = vrot.lane.b32.xlu0 %v5389_v48, %s5013_s19 }
 0xfca   : > { %v2466_v61 = vpop.xlane.xlu0 %2465 }
 0xfcb   : > { %4712 = vrcp.f32 %v2466_v61 }
 0xfd4   : > { %v2469_v62 = vpop.xlane.xlu0 %2468 }
 0xfd5   : > { %4714 = vrcp.f32 %v2469_v62 }
 0xfd8   : > { %v4713_v63 = vpop.eup %4712  ;;  %v2477_v0 = vpop.permute.xlu0 %2476 }
 0xfd9   : > { %v2482_v1 = vsel %vm1144_vm2, %v2477_v0, 0  ;;  %v2472_v3 = vmul.f32 %v4713_v63, %v4709_v42 }
 0xfda   : > { %4312 = vmatpush3.bf16.msra.mxu0 %v2482_v1 }
 0xfdb   : > { %v2474_v8 = vpack.c.bf16 %v2472_v3, %v2472_v3  ;;  %4323 = vmatprep.subr.bf16.mxu0 %v5005_v5  ;;  %v4598_v3 = vld [vmem:[%s5283_s8 + $0x28] sm:$0xff]  }
 0xfdc   : > { %v2573_v13 = vpop.permute.xlu0 %2572 }
 0xfdd   : > { %4314 = vmatmul.mubr.msk.bf16.vlgmr.msra.gmra.mxu0 %vm1116_vm3, %v2474_v8  ;;  %v4600_v8 = vld [vmem:[%s5283_s8 + $0x18] sm:$0xff]  }
 0xfde   : > { %4324 = vmatpush3.bf16.xpose.msra.mxu0 %v2580_v10  ;;  %4325 = vmatprep.mubr.msk.bf16.mxu0 %vm5006_vm0, %v5005_v5  ;;  %v4602_v10 = vld [vmem:[%s5283_s8 + $0x8] sm:$0xff]  }
 0xfdf   : > { %4335 = vmatprep.subr.bf16.mxu0 %v5005_v5 }
 0xfe2   : > { %v4715_v48 = vpop.eup %4714 }
 0xfe3   : > { %v2473_v11 = vmul.f32 %v4715_v48, %v4711_v55 }
 0xfe5   : > { %4326 = vmatmul.mubr.msk.bf16.vlgmr.msra.gmra.mxu0 %vm1021_vm1, %v2573_v13  ;;  %v2475_v14 = vpack.c.bf16 %v2473_v11, %v2473_v11  ;;  %v4603_v11 = vld [vmem:[%s5283_s8] sm:$0xff]  }
 0xfe6   : > { %4337 = vmatprep.mubr.msk.bf16.mxu0 %vm5006_vm0, %v5005_v5 }
 0xfe7   : > { %4320 = vmatmul.mubr.msk.bf16.vlgmr.msra.gmra.mxu1 %vm1116_vm3, %v2475_v14 }
 0xfe8   : > { %4330 = vmatpush3.bf16.xpose.msra.mxu1 %v2630_v16  ;;  %4331 = vmatprep.mubr.msk.bf16.mxu1 %vm5006_vm0, %v5005_v5 }
 0xfe9   : > { %4341 = vmatprep.subr.bf16.mxu1 %v5005_v5 }
 0xfef   : > { %4332 = vmatmul.mubr.msk.bf16.vlgmr.msra.gmra.mxu1 %vm1021_vm1, %v2623_v18 }
 0xff0   : > { %4343 = vmatprep.mubr.msk.bf16.mxu1 %vm5006_vm0, %v5005_v5 }
0x109d   : > { %v2518_v19 = vpop.f32.mrf.mxu0 }
0x109f   : > { %v4315_v20 = vpop.f32.mrf.mxu0 }
0x10a1   : > { %v2521_v21 = vpop.f32.mrf.mxu0 }
0x10a3   : > { %v4316_v22 = vpop.f32.mrf.mxu0 }
0x10a5   : > { %v2616_v23 = vpop.f32.mrf.mxu0 }
0x10a6   : > { %v2672_v24 = vmul.f32 0.28867513, %v2616_v23 }
0x10a7   : > { %v2566_v25 = vpop.f32.mrf.mxu1  ;;  %v4327_v27 = vpop.f32.mrf.mxu0 }
0x10a8   : > { %v2674_v28 = vsel %vm1116_vm3, %v2672_v24, -inf  ;;  %v4554_v47 = vpack.i.bf16 %v2566_v25, %v2518_v19 }
0x10a9   : > { %2675 = vmax.xlane.f32.xlu0 %v2674_v28  ;;  %v4321_v29 = vpop.f32.mrf.mxu1  ;;  %v2619_v30 = vpop.f32.mrf.mxu0 }
0x10ab   : > { %v2569_v31 = vpop.f32.mrf.mxu1  ;;  %v4328_v34 = vpop.f32.mrf.mxu0 }
0x10ad   : > { %v4322_v38 = vpop.f32.mrf.mxu1 }
0x10af   : > { %v2666_v39 = vpop.f32.mrf.mxu1 }
0x10b0   : > { %v2673_v43 = vmul.f32 0.28867513, %v2666_v39 }
0x10b1   : > { %v4333_v44 = vpop.f32.mrf.mxu1 }
0x10b2   : > { %v2677_v50 = vsel %vm1116_vm3, %v2673_v43, -inf }
0x10b3   : > { %2678 = vmax.xlane.f32.xlu1 %v2677_v50  ;;  %v2669_v54 = vpop.f32.mrf.mxu1 }
0x10b5   : > { %v4334_v42 = vpop.f32.mrf.mxu1 }
0x10c4   : > { %2746 = vrot.lane.b32.xlu1 %v5426_v26, %s5013_s19 }
0x10c8   : > { %4530 = vrot.lane.b32.xlu1 %v4529_v49, %s5013_s19 }
0x10cc   : > { %4535 = vrot.lane.b32.xlu1 %v4534_v53, %s5012_s20 }
0x10d0   : > { %4545 = vrot.lane.b32.xlu1 %v4544_v6, %s5010_s16 }
0x10d4   : > { %4555 = vrot.lane.b32.xlu1 %v4554_v47, %s5008_s9 }
0x1132   : > { %v2676_v55 = vpop.xlane.xlu0 %2675 }
0x1133   : > { %v2680_v26 = vsub.f32 %v2672_v24, %v2676_v55 }
0x1135   : > { %v2682_v51 = vmul.f32 1.442695, %v2680_v26 }
0x1137   : > { %4716 = vpow2.f32 %v2682_v51 }
0x113c   : > { %v2679_v61 = vpop.xlane.xlu1 %2678 }
0x113d   : > { %v2681_v36 = vsub.f32 %v2673_v43, %v2679_v61 }
0x113f   : > { %v2684_v45 = vmul.f32 1.442695, %v2681_v36 }
0x1140   : > { %v2747_v49 = vpop.permute.xlu1 %2746 }
0x1141   : > { %4718 = vpow2.f32 %v2684_v45  ;;  %v2752_v35 = vsel %vm1144_vm2, %v2747_v49, 0 }
0x1142   : > { %4342 = vmatpush3.bf16.msra.mxu1 %v2752_v35 }
0x1144   : > { %v4717_v46 = vpop.eup %4716  ;;  %v4531_v22 = vpop.permute.xlu1 %4530 }
0x1145   : > { %v2686_v53 = vsel %vm1116_vm3, %v4717_v46, 0.0  ;;  %v4533_v25 = vunpack.i.h.bf16 %v4531_v22  ;;  %v4532_v27 = vunpack.i.l.bf16 %v4531_v22  ;;  %v4618_v22 = vld [vmem:[%s5289_s1 + $0x64] ss:$12 sps:$4 sm:$0xff]  }
0x1146   : > { %2687 = vadd.xlane.f32.xlu0 %v2686_v53 }
0x1147   : > { %v2851_v39 = vsel %vm1021_vm1, %v5448_v56, %v4533_v25  ;;  %v2850_v43 = vsel %vm1021_vm1, %v5445_v41, %v4532_v27  ;;  %v4620_v25 = vld [vmem:[%s5289_s1 + $0x48] ss:$12 sps:$4 sm:$0xff]   ;;  %v4623_v27 = vld [vmem:[%s5289_s1 + $0x50] ss:$12 sps:$4 sm:$0xff]  }
0x1148   : > { %v4536_v23 = vpop.permute.xlu1 %4535 }
0x1149   : > { %v4538_v28 = vunpack.i.h.bf16 %v4536_v23  ;;  %v4537_v29 = vunpack.i.l.bf16 %v4536_v23  ;;  %v4619_v23 = vld [vmem:[%s5289_s1 + $0x68] ss:$12 sps:$4 sm:$0xff]  }
0x114b   : > { %v2853_v44 = vsel %vm2852_vm4, %v2850_v43, %v4537_v29  ;;  %v2854_v50 = vsel %vm2852_vm4, %v2851_v39, %v4538_v28  ;;  %v4626_v28 = vld [vmem:[%s5289_s1 + $0x34] ss:$12 sps:$4 sm:$0xff]   ;;  %v4624_v29 = vld [vmem:[%s5289_s1 + $0x30] ss:$12 sps:$4 sm:$0xff]  }
0x114c   : > { %v4546_v30 = vpop.permute.xlu1 %4545  ;;  %v4634_v39 = vld [vmem:[%s5289_s1 + $0x4] ss:$12 sps:$4 sm:$0xff]   ;;  %v4632_v43 = vld [vmem:[%s5289_s1] ss:$12 sps:$4 sm:$0xff]  }
0x114d   : > { %v4548_v26 = vunpack.i.h.bf16 %v4546_v30  ;;  %v4547_v51 = vunpack.i.l.bf16 %v4546_v30  ;;  %v4627_v30 = vld [vmem:[%s5289_s1 + $0x38] ss:$12 sps:$4 sm:$0xff]  }
0x114e   : > { %v4719_v59 = vpop.eup %4718 }
0x114f   : > { %v2689_v2 = vsel %vm1116_vm3, %v4719_v59, 0.0 }
0x1150   : > { %2690 = vadd.xlane.f32.xlu0 %v2689_v2  ;;  %v4556_v61 = vpop.permute.xlu1 %4555 }
0x1151   : > { %v4558_v56 = vunpack.i.h.bf16 %v4556_v61 }
0x1166   : > { %2698 = vrot.lane.b32.xlu0 %v5407_v57, %s5013_s19 }
0x116a   : > { %4540 = vrot.lane.b32.xlu0 %v4539_v60, %s5011_s22 }
0x116e   : > { %4550 = vrot.lane.b32.xlu0 %v4549_v17, %s5009_s29  ;;  %v4597_v17 = vld [vmem:[%s5283_s8 + $0x30] sm:$0xff]   ;;  %s5983_s29 = sld [smem:[#allocation21_spill]] }
0x1174   : > { %p4007_p11 = scmp.ne.s32.totalorder %s5983_s29, 1 }
0x11cf   : > { %v2688_v6 = vpop.xlane.xlu0 %2687 }
0x11d0   : > { %4720 = vrcp.f32 %v2688_v6 }
0x11d9   : > { %v2691_v62 = vpop.xlane.xlu0 %2690 }
0x11da   : > { %4722 = vrcp.f32 %v2691_v62 }
0x11dd   : > { %v4721_v63 = vpop.eup %4720  ;;  %v2699_v0 = vpop.permute.xlu0 %2698 }
0x11de   : > { %v2704_v57 = vsel %vm1144_vm2, %v2699_v0, 0  ;;  %v2694_v1 = vmul.f32 %v4721_v63, %v4717_v46  ;;  %v4557_v46 = vunpack.i.l.bf16 %v4556_v61 }
0x11df   : > { %4336 = vmatpush3.bf16.msra.mxu0 %v2704_v57  ;;  %v3945_v57 = vld [vmem:[%s5976_s13] ss:$0 sm:$0xff] }
0x11e0   : > { %v2696_v40 = vpack.c.bf16 %v2694_v1, %v2694_v1  ;;  %4347 = vmatprep.subr.bf16.mxu0 %v5005_v5 }
0x11e1   : > { %v4541_v24 = vpop.permute.xlu0 %4540 }
0x11e2   : > { %4338 = vmatmul.mubr.msk.bf16.vlgmr.msra.gmra.mxu0 %vm1116_vm3, %v2696_v40  ;;  %v4543_v31 = vunpack.i.h.bf16 %v4541_v24  ;;  %v4542_v34 = vunpack.i.l.bf16 %v4541_v24  ;;  %v4622_v24 = vld [vmem:[%s5289_s1 + $0x4c] ss:$12 sps:$4 sm:$0xff]  }
0x11e3   : > { %4363 = vmatprep.mubr.msk.bf16.mxu0 %vm5006_vm0, %v5005_v5  ;;  %4348 = vmatpush3.bf16.msra.mxu0 %v4596_v15 }
0x11e4   : > { %4349 = vmatprep.subr.bf16.mxu0 %v5005_v5  ;;  %v2856_v54 = vsel %vm2855_vm5, %v2853_v44, %v4542_v34  ;;  %v2857_v42 = vsel %vm2855_vm5, %v2854_v50, %v4543_v31  ;;  %v4630_v31 = vld [vmem:[%s5289_s1 + $0x1c] ss:$12 sps:$4 sm:$0xff]   ;;  %v4628_v34 = vld [vmem:[%s5289_s1 + $0x18] ss:$12 sps:$4 sm:$0xff]  }
0x11e5   : > { %v4551_v38 = vpop.permute.xlu0 %4550  ;;  %v2859_v36 = vsel %vm2858_vm6, %v2856_v54, %v4547_v51  ;;  %v2860_v45 = vsel %vm2858_vm6, %v2857_v42, %v4548_v26  ;;  %v4635_v44 = vld [vmem:[%s5289_s1 + $0x8] ss:$12 sps:$4 sm:$0xff]   ;;  %v4637_v50 = vld [vmem:[%s5291_s23 + $0x78] sm:$0xff]  }
0x11e6   : > { %v4553_v47 = vunpack.i.h.bf16 %v4551_v38  ;;  %v4552_v55 = vunpack.i.l.bf16 %v4551_v38  ;;  %v4631_v38 = vld [vmem:[%s5289_s1 + $0x20] ss:$12 sps:$4 sm:$0xff]  }
0x11e7   : > { %v4723_v58 = vpop.eup %4722  ;;  %4350 = vmatpush3.bf16.msra.mxu0 %v4597_v17 }
0x11e8   : > { %v2695_v60 = vmul.f32 %v4723_v58, %v4719_v59  ;;  %4351 = vmatprep.subr.bf16.mxu0 %v5005_v5  ;;  %v2862_v49 = vsel %vm2861_vm7, %v2859_v36, %v4552_v55  ;;  %v2863_v35 = vsel %vm2861_vm7, %v2860_v45, %v4553_v47 }
0x11e9   : > { %v2865_v2 = vsel %vm2864_vm8, %v2862_v49, %v4557_v46  ;;  %v2866_v6 = vsel %vm2864_vm8, %v2863_v35, %v4558_v56 }
0x11ea   : > { %v2697_v9 = vpack.c.bf16 %v2695_v60, %v2695_v60  ;;  %v4732_v60 = vld [vmem:[#allocation2] sm:$0xff] }
0x11eb   : > { %4352 = vmatpush3.bf16.msra.mxu0 %v4598_v3 }
0x11ec   : > { %4344 = vmatmul.mubr.msk.bf16.vlgmr.msra.gmra.mxu1 %vm1116_vm3, %v2697_v9  ;;  %4353 = vmatprep.subr.bf16.mxu0 %v5005_v5 }
0x11ed   : > { %3239 = vmatprep.mubr.bf16.mxu1 %v5004_v4  ;;  %v4601_v4 = vld [vmem:[%s5283_s8 + $0x10] sm:$0xff]  }
0x11ef   : > { %4354 = vmatpush3.bf16.msra.mxu0 %v4599_v7 }
0x11f0   : > { %4355 = vmatprep.subr.bf16.mxu0 %v5005_v5 }
0x11f3   : > { %4356 = vmatpush3.bf16.msra.mxu0 %v4600_v8  ;;  %v4733_v8 = vld [vmem:[#allocation2 + $0x8] sm:$0xff] }
0x11f4   : > { %4357 = vmatprep.subr.bf16.mxu0 %v5005_v5 }
0x11f7   : > { %4358 = vmatpush3.bf16.msra.mxu0 %v4601_v4 }
0x11f8   : > { %4359 = vmatprep.subr.bf16.mxu0 %v5005_v5 }
0x11fb   : > { %4360 = vmatpush3.bf16.msra.mxu0 %v4602_v10 }
0x11fc   : > { %4361 = vmatprep.subr.bf16.mxu0 %v5005_v5 }
0x11ff   : > { %4362 = vmatpush3.bf16.msra.mxu0 %v4603_v11  ;;  %v4604_v11 = vld [vmem:[%s5289_s1 + $0xa8] ss:$12 sps:$4 sm:$0xff]  }
0x1200   : > { %4367 = vmatprep.subr.bf16.mxu0 %v5005_v5 }
0x12a2   : > { %v2740_v48 = vpop.f32.mrf.mxu0 }
0x12a4   : > { %v4339_v12 = vpop.f32.mrf.mxu0 }
0x12a5   : > { %v4607_v12 = vld [vmem:[%s5289_s1 + $0xb0] ss:$12 sps:$4 sm:$0xff]  }
0x12a6   : > { %v2743_v13 = vpop.f32.mrf.mxu0 }
0x12a7   : > { %v4610_v13 = vld [vmem:[%s5289_s1 + $0x94] ss:$12 sps:$4 sm:$0xff]  }
0x12a8   : > { %v4340_v14 = vpop.f32.mrf.mxu0 }
0x12a9   : > { %v4608_v14 = vld [vmem:[%s5289_s1 + $0x90] ss:$12 sps:$4 sm:$0xff]  }
0x12ac   : > { %v2788_v16 = vpop.f32.mrf.mxu1 }
0x12ad   : > { %v4559_v18 = vpack.i.bf16 %v2788_v16, %v2740_v48  ;;  %v4606_v48 = vld [vmem:[%s5289_s1 + $0xac] ss:$12 sps:$4 sm:$0xff]  }
0x12ae   : > { %v4345_v19 = vpop.f32.mrf.mxu1  ;;  %3207 = vmatprep.subr.bf16.mxu1 %v4606_v48  ;;  %v4611_v16 = vld [vmem:[%s5289_s1 + $0x98] ss:$12 sps:$4 sm:$0xff]   ;;  %v4644_v48 = vld [vmem:[%s5291_s23 + $0x28] sm:$0xff]  }
0x12af   : > { %4560 = vrot.lane.b32.xlu0 %v4559_v18, %s5007_s0  ;;  %3208 = vmatpush1.bf16.msra.mxu1 %v4604_v11  ;;  %v4614_v18 = vld [vmem:[%s5289_s1 + $0x7c] ss:$12 sps:$4 sm:$0xff]   ;;  %v4612_v19 = vld [vmem:[%s5289_s1 + $0x78] ss:$12 sps:$4 sm:$0xff]  }
0x12b0   : > { %v2791_v20 = vpop.f32.mrf.mxu1  ;;  %3209 = vmatprep.subr.bf16.mxu1 %v4610_v13  ;;  %v4646_v11 = vld [vmem:[%s5291_s23 + $0x60] sm:$0xff]  }
0x12b1   : > { %v4615_v20 = vld [vmem:[%s5289_s1 + $0x80] ss:$12 sps:$4 sm:$0xff]  }
0x12b2   : > { %v4346_v21 = vpop.f32.mrf.mxu1  ;;  %v4647_v13 = vld [vmem:[%s5291_s23 + $0x20] sm:$0xff]  }
0x12b3   : > { %3210 = vmatpush1.bf16.msra.mxu1 %v4608_v14  ;;  %v4616_v21 = vld [vmem:[%s5289_s1 + $0x60] ss:$12 sps:$4 sm:$0xff]   ;;  %v4649_v14 = vld [vmem:[%s5291_s23 + $0x58] sm:$0xff]  }
0x12b4   : > { %3211 = vmatprep.subr.bf16.mxu1 %v4614_v18  ;;  %v4650_v18 = vld [vmem:[%s5291_s23 + $0x18] sm:$0xff]  }
0x12b7   : > { %3212 = vmatpush1.bf16.msra.mxu1 %v4612_v19  ;;  %v4651_v19 = vld [vmem:[%s5291_s23 + $0x90] sm:$0xff]  }
0x12b8   : > { %3213 = vmatprep.subr.bf16.mxu1 %v4618_v22  ;;  %v4654_v22 = vld [vmem:[%s5291_s23 + $0x88] sm:$0xff]  }
0x12bb   : > { %3214 = vmatpush1.bf16.msra.mxu1 %v4616_v21  ;;  %v4653_v21 = vld [vmem:[%s5291_s23 + $0x10] sm:$0xff]  }
0x12bc   : > { %3215 = vmatprep.subr.bf16.mxu1 %v4622_v24  ;;  %v4656_v24 = vld [vmem:[%s5291_s23 + $0x8] sm:$0xff]  }
0x12bf   : > { %3216 = vmatpush1.bf16.msra.mxu1 %v4620_v25  ;;  %v4657_v25 = vld [vmem:[%s5291_s23 + $0x80] sm:$0xff]  }
0x12c0   : > { %3217 = vmatprep.subr.bf16.mxu1 %v4626_v28  ;;  %v4659_v28 = vld [vmem:[%s5291_s23] sm:$0xff]  }
0x12c3   : > { %3218 = vmatpush1.bf16.msra.mxu1 %v4624_v29  ;;  %v3062_v29 = vld [vmem:[%s5325_s2] sm:$0x7] }
0x12c4   : > { %3219 = vmatprep.subr.bf16.mxu1 %v4630_v31 }
0x12c7   : > { %3220 = vmatpush1.bf16.msra.mxu1 %v4628_v34 }
0x12c8   : > { %3221 = vmatprep.subr.bf16.mxu1 %v4634_v39 }
0x12cb   : > { %3222 = vmatpush1.bf16.msra.mxu1 %v4632_v43 }
0x12cc   : > { %4104 = vmatprep.subr.bf16.mxu1 %v4637_v50 }
0x1321   : > { %v4561_v41 = vpop.permute.xlu0 %4560 }
0x1322   : > { %v4563_v53 = vunpack.i.h.bf16 %v4561_v41  ;;  %v4562_v59 = vunpack.i.l.bf16 %v4561_v41 }
0x1324   : > { %v2869_v62 = vsel %vm2867_vm9, %v2866_v6, %v4563_v53  ;;  %v2868_v63 = vsel %vm2867_vm9, %v2865_v2, %v4562_v59  ;;  %v3954_v6 = vld [vmem:[%s5978_s12] ss:$0 sm:$0xff] }
0x1325   : > { %v2870_v0 = vpack.c.bf16 %v2869_v62, %v2868_v63 }
0x1327   : > { %4364 = vmatmul.mubr.bf16.vlgmr.msra.gmra.mxu0 %v2870_v0 }
0x1328   : > { %4383 = vmatprep.mubr.msk.bf16.mxu0 %vm5006_vm0, %v5005_v5  ;;  %4368 = vmatpush3.bf16.msra.mxu0 %v4607_v12  ;;  %v4645_v12 = vld [vmem:[%s5291_s23 + $0xa0] sm:$0xff]  }
0x1329   : > { %4369 = vmatprep.subr.bf16.mxu0 %v5005_v5 }
0x132c   : > { %4370 = vmatpush3.bf16.msra.mxu0 %v4611_v16  ;;  %v4648_v16 = vld [vmem:[%s5291_s23 + $0x98] sm:$0xff]  }
0x132d   : > { %4371 = vmatprep.subr.bf16.mxu0 %v5005_v5 }
0x1330   : > { %4372 = vmatpush3.bf16.msra.mxu0 %v4615_v20  ;;  %v4652_v20 = vld [vmem:[%s5291_s23 + $0x50] sm:$0xff]  }
0x1331   : > { %4373 = vmatprep.subr.bf16.mxu0 %v5005_v5 }
0x1334   : > { %4374 = vmatpush3.bf16.msra.mxu0 %v4619_v23  ;;  %v4655_v23 = vld [vmem:[%s5291_s23 + $0x48] sm:$0xff]  }
0x1335   : > { %4375 = vmatprep.subr.bf16.mxu0 %v5005_v5 }
0x1338   : > { %4376 = vmatpush3.bf16.msra.mxu0 %v4623_v27  ;;  %v4658_v27 = vld [vmem:[%s5291_s23 + $0x40] sm:$0xff]  }
0x1339   : > { %4377 = vmatprep.subr.bf16.mxu0 %v5005_v5 }
0x133c   : > { %4378 = vmatpush3.bf16.msra.mxu0 %v4627_v30  ;;  %v3075_v30 = vrot.slane %v3062_v29, %v798_v52 }
0x133d   : > { %4379 = vmatprep.subr.bf16.mxu0 %v5005_v5 }
0x1340   : > { %4380 = vmatpush3.bf16.msra.mxu0 %v4631_v38  ;;  %v3071_v38 = vrot.slane %v3062_v29, %v794_v33 }
0x1341   : > { %4381 = vmatprep.subr.bf16.mxu0 %v5005_v5 }
0x1344   : > { %4382 = vmatpush3.bf16.msra.mxu0 %v4635_v44 }
0x1345   : > { %4387 = vmatprep.subr.bf16.mxu0 %v5005_v5 }
0x13e7   : > { %v2976_v1 = vpop.f32.mrf.mxu0 }
0x13e8   : > { %v2977_v40 = vadd.f32 %v3945_v57, %v2976_v1  ;;  %v3955_v1 = vld [vmem:[%s727_s15] ss:$0 sm:$0xff] }
0x13e9   : > { %v4365_v58 = vpop.f32.mrf.mxu0 }
0x13ea   : > { %v5760_v9 = vadd.f32 %v4732_v60, %v2977_v40 }
0x13eb   : > { %v2979_v15 = vpop.f32.mrf.mxu0 }
0x13ec   : > { %v2980_v17 = vadd.f32 %v3945_v57, %v2979_v15  ;;  %2987 = vadd.xlane.f32.xlu1 %v5760_v9  ;;  %v2993_v3 = vmul.f32 %v5760_v9, %v5760_v9  ;;  %v4638_v15 = vld [vmem:[%s5291_s23 + $0x38] sm:$0xff]  }
0x13ed   : > { %v4366_v7 = vpop.f32.mrf.mxu0 }
0x13ee   : > { %2995 = vadd.xlane.f32.xlu0 %v2993_v3  ;;  %v5765_v4 = vadd.f32 %v4733_v8, %v2980_v17  ;;  %v4640_v3 = vld [vmem:[%s5291_s23 + $0x70] sm:$0xff]  }
0x13ef   : > { %v4639_v7 = vld [vmem:[%s5291_s23 + $0xb0] sm:$0xff]  }
0x13f0   : > { %v2994_v10 = vmul.f32 %v5765_v4, %v5765_v4  ;;  %v4641_v8 = vld [vmem:[%s5291_s23 + $0x30] sm:$0xff]  }
0x13f2   : > { %2989 = vadd.xlane.f32.xlu0 %v5765_v4 }
0x13f6   : > { %2997 = vadd.xlane.f32.xlu0 %v2994_v10  ;;  %v4642_v10 = vld [vmem:[%s5291_s23 + $0xa8] sm:$0xff]  }
0x1475   : > { %v2988_v54 = vpop.xlane.xlu1 %2987 }
0x1476   : > { %v2991_v42 = vmul.f32 0.010416667, %v2988_v54 }
0x1477   : > { %v2996_v47 = vpop.xlane.xlu0 %2995 }
0x1478   : > { %v3001_v55 = vmul.f32 %v2991_v42, %v2991_v42  ;;  %v2999_v26 = vmul.f32 0.010416667, %v2996_v47  ;;  %v3005_v59 = vsub.f32 %v5760_v9, %v2991_v42  ;;  %v4636_v9 = vld [vmem:[%s5291_s23 + $0xb8] sm:$0xff]  }
0x147a   : > { %v3003_v51 = vsub.f32 %v2999_v26, %v3001_v55 }
0x147b   : > { %v2990_v61 = vpop.xlane.xlu0 %2989 }
0x147c   : > { %v3007_v36 = vadd.f32 1e-05, %v3003_v51  ;;  %v2992_v45 = vmul.f32 0.010416667, %v2990_v61 }
0x147e   : > { %4724 = vrsqrt.f32 %v3007_v36  ;;  %v3002_v35 = vmul.f32 %v2992_v45, %v2992_v45  ;;  %v3006_v62 = vsub.f32 %v5765_v4, %v2992_v45  ;;  %v4643_v4 = vld [vmem:[%s5291_s23 + $0x68] sm:$0xff]  }
0x147f   : > { %v2998_v49 = vpop.xlane.xlu0 %2997 }
0x1480   : > { %v3000_v56 = vmul.f32 0.010416667, %v2998_v49 }
0x1482   : > { %v3004_v46 = vsub.f32 %v3000_v56, %v3002_v35 }
0x1484   : > { %v3008_v41 = vadd.f32 1e-05, %v3004_v46 }
0x1486   : > { %4726 = vrsqrt.f32 %v3008_v41 }
0x148b   : > { %v4725_v53 = vpop.eup %4724 }
0x148c   : > { %v3011_v2 = vmul.f32 %v4725_v53, %v3005_v59 }
0x148e   : > { %v3019_v57 = vmul.f32 %v3954_v6, %v3011_v2 }
0x1490   : > { %v5815_v58 = vadd.f32 %v3955_v1, %v3019_v57 }
0x1493   : > { %v4727_v63 = vpop.eup %4726 }
0x1494   : > { %v3012_v0 = vmul.f32 %v4727_v63, %v3006_v62 }
0x1496   : > { %v3020_v40 = vmul.f32 %v3954_v6, %v3012_v0  ;;  %v3980_v6 = vld [vmem:[%s734_s27] ss:$0 sm:$0xff] }
0x1498   : > { %v5817_v60 = vadd.f32 %v3955_v1, %v3020_v40 }
0x149a   : > { %v3029_v17 = vpack.c.bf16 %v5817_v60, %v5815_v58 }
0x149c   : > { %3240 = vmatmul.mubr.bf16.vlgmr.msra.gmra.mxu1 %v3029_v17  ;;  %4384 = vmatmul.mubr.bf16.vlgmr.msra.gmra.mxu0 %v3029_v17 }
0x149d   : > { %4388 = vmatpush3.bf16.msra.mxu0 %v4636_v9  ;;  %4105 = vmatpush3.bf16.msra.mxu1 %v4638_v15 }
0x149e   : > { %4389 = vmatprep.subr.bf16.mxu0 %v5005_v5  ;;  %4106 = vmatprep.subr.bf16.mxu1 %v4640_v3 }
0x149f   : > { %4403 = vmatprep.mubr.msk.bf16.mxu0 %vm5006_vm0, %v5005_v5 }
0x14a1   : > { %4390 = vmatpush3.bf16.msra.mxu0 %v4639_v7  ;;  %4107 = vmatpush3.bf16.msra.mxu1 %v4641_v8 }
0x14a2   : > { %4391 = vmatprep.subr.bf16.mxu0 %v5005_v5  ;;  %4108 = vmatprep.subr.bf16.mxu1 %v4643_v4 }
0x14a5   : > { %4392 = vmatpush3.bf16.msra.mxu0 %v4642_v10  ;;  %4109 = vmatpush3.bf16.msra.mxu1 %v4644_v48 }
0x14a6   : > { %4393 = vmatprep.subr.bf16.mxu0 %v5005_v5  ;;  %4110 = vmatprep.subr.bf16.mxu1 %v4646_v11 }
0x14a9   : > { %4394 = vmatpush3.bf16.msra.mxu0 %v4645_v12  ;;  %4111 = vmatpush3.bf16.msra.mxu1 %v4647_v13 }
0x14aa   : > { %4395 = vmatprep.subr.bf16.mxu0 %v5005_v5  ;;  %4112 = vmatprep.subr.bf16.mxu1 %v4649_v14 }
0x14ad   : > { %4396 = vmatpush3.bf16.msra.mxu0 %v4648_v16  ;;  %4113 = vmatpush3.bf16.msra.mxu1 %v4650_v18 }
0x14ae   : > { %4397 = vmatprep.subr.bf16.mxu0 %v5005_v5  ;;  %4114 = vmatprep.subr.bf16.mxu1 %v4652_v20 }
0x14b1   : > { %4398 = vmatpush3.bf16.msra.mxu0 %v4651_v19  ;;  %4115 = vmatpush3.bf16.msra.mxu1 %v4653_v21 }
0x14b2   : > { %4399 = vmatprep.subr.bf16.mxu0 %v5005_v5  ;;  %4116 = vmatprep.subr.bf16.mxu1 %v4655_v23 }
0x14b5   : > { %4400 = vmatpush3.bf16.msra.mxu0 %v4654_v22  ;;  %4117 = vmatpush3.bf16.msra.mxu1 %v4656_v24 }
0x14b6   : > { %4401 = vmatprep.subr.bf16.mxu0 %v5005_v5  ;;  %4118 = vmatprep.subr.bf16.mxu1 %v4658_v27  ;;  %v3067_v5 = vrot.slane %v3062_v29, %v790_v37  ;;  %v4005_v27 = vld [vmem:[%s737_s7] ss:$0 sm:$0xff] }
0x14b7   : > { %v4006_v29 = vld [vmem:[%s740_s6] ss:$0 sm:$0xff] }
0x14b9   : > { %4402 = vmatpush3.bf16.msra.mxu0 %v4657_v25  ;;  %4119 = vmatpush3.bf16.msra.mxu1 %v4659_v28 }
0x155c   : > { %v3241_v31 = vpop.f32.mrf.mxu1  ;;  %v3284_v34 = vpop.f32.mrf.mxu0 }
0x155d   : > { %v3285_v44 = vadd.f32 %v3284_v34, %v3075_v30  ;;  %v3242_v26 = vadd.f32 %v3241_v31, %v3067_v5 }
0x155e   : > { %v3243_v39 = vpop.f32.mrf.mxu1  ;;  %v4385_v43 = vpop.f32.mrf.mxu0 }
0x155f   : > { %v3244_v42 = vadd.f32 %v3243_v39, %v3071_v38  ;;  %v3293_v52 = vmax.f32 %v3285_v44, 0.0  ;;  %v3291_v37 = vmax.f32 %v3242_v26, 0.0 }
0x1560   : > { %v3245_v50 = vpop.f32.mrf.mxu1  ;;  %v3287_v54 = vpop.f32.mrf.mxu0 }
0x1561   : > { %v3246_v47 = vadd.f32 %v3245_v50, %v3067_v5  ;;  %v3288_v55 = vadd.f32 %v3287_v54, %v3075_v30  ;;  %v3292_v33 = vmax.f32 %v3244_v42, 0.0 }
0x1562   : > { %v3247_v51 = vpop.f32.mrf.mxu1  ;;  %v4386_v61 = vpop.f32.mrf.mxu0 }
0x1563   : > { %v3296_v36 = vmax.f32 %v3288_v55, 0.0  ;;  %v3248_v45 = vadd.f32 %v3247_v51, %v3071_v38  ;;  %v3294_v49 = vmax.f32 %v3246_v47, 0.0 }
0x1565   : > { %v3299_v35 = vpack.c.bf16 %v3296_v36, %v3293_v52  ;;  %v3295_v32 = vmax.f32 %v3248_v45, 0.0  ;;  %v3297_v46 = vpack.c.bf16 %v3294_v49, %v3291_v37 }
0x1567   : > { %v3298_v56 = vpack.c.bf16 %v3295_v32, %v3292_v33  ;;  %4404 = vmatmul.mubr.bf16.vlgmr.msra.gmra.mxu0 %v3299_v35 }
0x1569   : > { %3531 = vmatprep.mubr.bf16.mxu1 %v3298_v56 }
0x156a   : > { %3532 = vmatmul.mubr.bf16.vlgmr.msra.gmra.mxu1 %v3297_v46 }
0x1627   : > { %v3574_v41 = vpop.f32.mrf.mxu0 }
0x1629   : > { %v4405_v53 = vpop.f32.mrf.mxu0 }
0x162a   : > { %v4120_v59 = vpop.f32.mrf.mxu1 }
0x162b   : > { %v3577_v2 = vpop.f32.mrf.mxu0 }
0x162c   : > { %v4121_v62 = vpop.f32.mrf.mxu1 }
0x162d   : > { %v4122_v63 = vadd.f32 %v4121_v62, %v4120_v59  ;;  %v4406_v0 = vpop.f32.mrf.mxu0 }
0x162e   : > { %v4123_v57 = vpop.f32.mrf.mxu1 }
0x162f   : > { %v3534_v1 = vadd.f32 %v4122_v63, %v3980_v6 }
0x1630   : > { %v4124_v40 = vpop.f32.mrf.mxu1 }
0x1631   : > { %v3575_v9 = vadd.f32 %v3574_v41, %v3534_v1  ;;  %v4125_v15 = vadd.f32 %v4124_v40, %v4123_v57 }
0x1633   : > { %v3537_v17 = vadd.f32 %v4125_v15, %v3980_v6  ;;  %v3581_v3 = vadd.f32 %v3575_v9, %v5815_v58 }
0x1635   : > { %v3578_v7 = vadd.f32 %v3577_v2, %v3537_v17  ;;  %3585 = vadd.xlane.f32.xlu1 %v3581_v3  ;;  %v3591_v4 = vmul.f32 %v3581_v3, %v3581_v3 }
0x1637   : > { %v3582_v8 = vadd.f32 %v3578_v7, %v5817_v60 }
0x1639   : > { %3587 = vadd.xlane.f32.xlu0 %v3582_v8  ;;  %3593 = vadd.xlane.f32.xlu1 %v3591_v4  ;;  %v3592_v10 = vmul.f32 %v3582_v8, %v3582_v8 }
0x163d   : > { %3595 = vadd.xlane.f32.xlu0 %v3592_v10 }
0x16be   : > { %v3586_v48 = vpop.xlane.xlu1 %3585 }
0x16bf   : > { %v3589_v11 = vmul.f32 0.010416667, %v3586_v48 }
0x16c1   : > { %v3599_v14 = vmul.f32 %v3589_v11, %v3589_v11  ;;  %v3603_v24 = vsub.f32 %v3581_v3, %v3589_v11 }
0x16c2   : > { %v3588_v12 = vpop.xlane.xlu0 %3587  ;;  %v3594_v13 = vpop.xlane.xlu1 %3593 }
0x16c3   : > { %v3590_v16 = vmul.f32 0.010416667, %v3588_v12  ;;  %v3597_v18 = vmul.f32 0.010416667, %v3594_v13 }
0x16c5   : > { %v3601_v19 = vsub.f32 %v3597_v18, %v3599_v14  ;;  %v3600_v20 = vmul.f32 %v3590_v16, %v3590_v16  ;;  %v3604_v30 = vsub.f32 %v3582_v8, %v3590_v16 }
0x16c6   : > { %v3596_v58 = vpop.xlane.xlu0 %3595 }
0x16c7   : > { %v3605_v21 = vadd.f32 1e-05, %v3601_v19  ;;  %v3598_v22 = vmul.f32 0.010416667, %v3596_v58 }
0x16c9   : > { %4728 = vrsqrt.f32 %v3605_v21  ;;  %v3602_v60 = vsub.f32 %v3598_v22, %v3600_v20 }
0x16cb   : > { %v3606_v23 = vadd.f32 1e-05, %v3602_v60 }
0x16cd   : > { %4730 = vrsqrt.f32 %v3606_v23 }
0x16d6   : > { %v4729_v25 = vpop.eup %4728 }
0x16d7   : > { %v3609_v28 = vmul.f32 %v4729_v25, %v3603_v24 }
0x16d9   : > { %v3617_v31 = vmul.f32 %v4005_v27, %v3609_v28 }
0x16da   : > { %v4731_v34 = vpop.eup %4730 }
0x16db   : > { %v3625_v38 = vadd.f32 %v4006_v29, %v3617_v31  ;;  %v3610_v5 = vmul.f32 %v4731_v34, %v3604_v30 }
0x16dd   : > { %3627 = vst [vmem:[#allocation2] sm:$0xff] %v3625_v38  ;;  %v3618_v39 = vmul.f32 %v4005_v27, %v3610_v5  ;;  %3632 = sbr.rel (%p4007_p11) target bundleno = 5859 (0x16e3), region = 104 }
0x16df   : > { %v3626_v43 = vadd.f32 %v4006_v29, %v3618_v39 }
0x16e1   : > { %3628 = vst [vmem:[#allocation2 + $0x8] sm:$0xff] %v3626_v43 }
0x16e2   : > { %3633 = vst [vmem:[#allocation14] sm:$0xff] %v3625_v38  ;;  %3634 = vst [vmem:[#allocation14 + $0x8] sm:$0xff] %v3626_v43 }
0x16e3 PF: > { %p4459_p0 = scmp.eq.s32.totalorder %s5185_s4, 1  ;;  %s5014_s7 = smov [#allocation14]  }
0x16e4   : > { %s3644_s17 = sshll.u32 %s5014_s7, 4  ;;  %s3645_s17 = int_to_ptr.vmem [resolvable:$true] %s3644_s17 }
0x16e5   : > { %s4900_s6 = scalar_lea.vmem %s3645_s17, 256  ;;  %p4907_p12 = scmp.lt.s32.totalorder %s3645_s17, %s3645_s17 }
0x16e6   : > { %p4901_p1 = scmp.ne.s32.totalorder %s3645_s17, %s4900_s6  ;;  %p4908_p3 = scmp.lt.s32.totalorder %s4900_s6, %s4900_s6 }
0x16e8   : > { %p4902_p9 = pnand %p4901_p1, %p4459_p0  ;;  %p4909_p13 = por %p4908_p3, %p4907_p12 }
0x16ea   : > { %p4903_p10 = pneg %p4902_p9 }
0x16ec   : > { %p4910_p2 = pnand %p4909_p13, %p4903_p10 }
0x16ee   : > { %4913 = shalt.err (!%p4910_p2)
}
0x16ef   : > { %s5015_s16 = smov 128   ;;  %s5016_s22 = smov 8  }
0x16f0   : > { %s5984_s8 = sld [smem:[#allocation38_spill]] }
0x16f6   : > { %4433 = dma.vmem_to_hbm [thread:$0]  (%p4459_p0), %s3645_s17, 256, %s5984_s8, [#allocation5], %s5015_s16, %s5015_s16, %s5016_s22  }
0x16f7   : > { %4965 = dma.done.wait (%p4459_p0), [#allocation5], 256  }
0x16f8   : > { %4967 = vsyncadd (%p4459_p0), [#allocation5], 4294967040 }
0x16f9 PF: > { %s34_s30 = sadd.s32 1, %s4990_s30   ;;  %s5985_s18 = sld [smem:[#allocation20_spill]] }
0x16fa   : > { %p31_p4 = scmp.ge.s32.totalorder %s34_s30, 4   ;;  %s5986_s27 = sld [smem:[#allocation24_spill]] }
0x16fb   : > { %s5987_s28 = sld [smem:[#allocation22_spill]]  ;;  %s5989_s25 = smov %s4974_s26 }
0x16fc   : > { %s5988_s29 = sld [smem:[#allocation23_spill]]  ;;  %33 = sbr.rel (!%p31_p4) target bundleno = 25 (0x19), region = 193 }
0x16ff   : > { %s5990_s26 = smov %s5985_s18 }
0x1701   :  { %3660 = vsyncpa [#allocation4], 1 }
0x1702   :  { %3662 = vsyncpa [#allocation4 + $0x1], 1 }
0x1703   :  { %3663 = vsyncpa [#allocation7], 1 }
0x1704   :  { %3665 = vsyncpa [#allocation7 + $0x1], 1 }
0x1705   :  { %3666 = vsyncpa [#allocation10], 1 }
0x1706   :  { %3668 = vsyncpa [#allocation10 + $0x1], 1 }
0x1707   :  { %3669 = vsyncpa [#allocation13], 1 }
0x1708   :  { %3671 = vsyncpa [#allocation13 + $0x1], 1 }
0x1709   :  { %3672 = vsyncpa [#allocation5], 1 }
0x170a   :  { %3674 = vsyncpa [#allocation5 + $0x1], 1 }

</bundles_post_ra>
